<compile_context>
chip_gen: v5e
topology: v5e:2x2
jax: 0.10.0
libtpu: 0.0.40
codegen_flags: <defaults>
</compile_context>

<pallas_src>
import jax
import jax.numpy as jnp
from jax import lax
from jax.experimental import pallas as pl
from jax.experimental.pallas import tpu as pltpu


# --------------------------------------------------------------------------
# Kernels
# --------------------------------------------------------------------------
def _make_single_step_kernel(vocab: int, v_pad: int):
    """Whole forward in one grid step (vocab fits one VMEM tile)."""
    needs_mask = vocab != v_pad

    def kernel(x_ref, w12_ref, b12_ref, w3_ref, b3_ref, out_ref):
        # Fused linear1/linear2 via the block-diagonal weight, f32 accumulation.
        h = (jnp.dot(x_ref[...], w12_ref[...],
                     preferred_element_type=jnp.float32) + b12_ref[...])
        # linear3 over the whole (padded) vocab: (1,256) x (256, v_pad).
        s = (jnp.dot(h.astype(w3_ref.dtype), w3_ref[...],
                     preferred_element_type=jnp.float32) + b3_ref[...])
        if needs_mask:
            col = lax.broadcasted_iota(jnp.int32, s.shape, 1)
            s = jnp.where(col < vocab, s, -jnp.inf)
        m = jnp.max(s, axis=-1, keepdims=True)
        lse = m + jnp.log(jnp.sum(jnp.exp(s - m), axis=-1, keepdims=True))
        out_ref[...] = s - lse

    return kernel


def _make_tiled_kernel(vocab: int, v_pad: int, tn: int):
    """Streamed-vocab-tile path: resident logits + online LSE + fused norm."""
    needs_mask = vocab != v_pad

    def kernel(x_ref, w12_ref, b12_ref, w3_ref, b3_ref, out_ref,
               h_ref, m_ref, l_ref):
        j = pl.program_id(0)
        last = pl.num_programs(0) - 1

        # Hidden vector computed once (first vocab tile), kept resident (bf16).
        @pl.when(j == 0)
        def _init():
            h = (jnp.dot(x_ref[...], w12_ref[...],
                         preferred_element_type=jnp.float32) + b12_ref[...])
            h_ref[...] = h.astype(h_ref.dtype)
            m_ref[...] = jnp.full_like(m_ref, -jnp.inf)
            l_ref[...] = jnp.zeros_like(l_ref)

        # linear3 on this vocab tile: (1,256) x (256,TN), bf16 MXU, f32 acc.
        s = (jnp.dot(h_ref[...], w3_ref[...],
                     preferred_element_type=jnp.float32)
             + b3_ref[pl.ds(j, 1), :])

        # Mask padded vocab lanes so they don't pollute max / sum-exp.
        if needs_mask:
            col = j * tn + lax.broadcasted_iota(jnp.int32, s.shape, 1)
            s = jnp.where(col < vocab, s, -jnp.inf)

        # Store raw logits into the resident (num_tiles, TN) output buffer.
        out_ref[pl.ds(j, 1), :] = s

        # Online log-sum-exp across vocab tiles.
        m_prev = m_ref[...]
        m_new = jnp.maximum(m_prev, jnp.max(s, axis=-1, keepdims=True))
        l_new = (l_ref[...] * jnp.exp(m_prev - m_new)
                 + jnp.sum(jnp.exp(s - m_new), axis=-1, keepdims=True))
        m_ref[...] = m_new
        l_ref[...] = l_new

        # Fused normalization: subtract the global LSE in place on the last
        # tile.  (Output buffer is only written back to HBM once, after this.)
        @pl.when(j == last)
        def _finalize():
            out_ref[...] = out_ref[...] - (m_new + jnp.log(l_new))

    return kernel


# --------------------------------------------------------------------------
# One-time parameter preprocessing (model-load time, not per call)
# --------------------------------------------------------------------------
def _round_up(x: int, m: int) -> int:
    return ((x + m - 1) // m) * m


def prepare_params(params, *, tile_n=8192, single_step_vpad_max=16384,
                   w3_dtype=jnp.bfloat16):
    """PyTorch-layout params -> kernel-layout params (fused/transposed/padded)."""
    assert tile_n % 128 == 0, "vocab tile must be a multiple of 128 lanes"
    w1, b1, w2, b2, w3, b3 = (params[k] for k in
                              ("w1", "b1", "w2", "b2", "w3", "b3"))
    f1, f2 = w1.shape[1], w2.shape[1]
    vocab = w3.shape[0]

    # Fold linear1/linear2 into a single block-diagonal (F1+F2, 256) dot.
    w12 = jnp.zeros((f1 + f2, 256), jnp.float32)
    w12 = w12.at[:f1, :128].set(jnp.transpose(w1).astype(jnp.float32))
    w12 = w12.at[f1:, 128:].set(jnp.transpose(w2).astype(jnp.float32))
    b12 = jnp.concatenate([b1, b2]).reshape(1, 256).astype(jnp.float32)

    # Choose single-step (all-VMEM) vs streamed-tile path.
    v128 = _round_up(vocab, 128)
    if v128 <= single_step_vpad_max:
        v_pad, tn, num_tiles = v128, v128, 1
    else:
        v_pad = _round_up(vocab, tile_n)
        tn, num_tiles = tile_n, v_pad // tile_n

    pad = v_pad - vocab
    w3_p = jnp.pad(w3.astype(jnp.float32), ((0, pad), (0, 0)))
    b3_p = jnp.pad(b3.astype(jnp.float32), ((0, pad),))

    w3_bytes = jnp.dtype(w3_dtype).itemsize
    vmem_est = 2 * 256 * tn * w3_bytes + 3 * 4 * v_pad + (1 << 20)
    vmem_limit = int(min(max(2 * vmem_est, 32 << 20), 100 << 20))

    return {
        "w12": w12,                                   # (F1+F2, 256) f32 blockdiag
        "b12": b12,                                   # (1, 256) f32
        "w3t": jnp.transpose(w3_p).astype(w3_dtype),  # (256, v_pad) bf16
        "b3r": b3_p.reshape(num_tiles, tn),           # resident bias, f32
        "vocab": vocab, "v_pad": v_pad,
        "tile_n": tn, "num_tiles": num_tiles,
        "vmem_limit_bytes": vmem_limit,
    }


# --------------------------------------------------------------------------
# Forward
# --------------------------------------------------------------------------
def ngram_model_forward(ngram_feat, pinyin_feat, prep):
    """ngram_feat: (F1,), pinyin_feat: (F2,) -> log-probs (1, vocb_size)."""
    vocab, v_pad = prep["vocab"], prep["v_pad"]
    tn, num_tiles = prep["tile_n"], prep["num_tiles"]

    x = jnp.concatenate([ngram_feat, pinyin_feat]).reshape(1, -1)
    x = x.astype(jnp.float32)

    def _full(arr):
        nd = arr.ndim
        return pl.BlockSpec(arr.shape, lambda j: (0,) * nd)

    if num_tiles == 1:
        kernel = _make_single_step_kernel(vocab, v_pad)
        scratch = []
    else:
        kernel = _make_tiled_kernel(vocab, v_pad, tn)
        scratch = [pltpu.VMEM((1, 256), prep["w3t"].dtype),  # resident hidden
                   pltpu.VMEM((1, 1), jnp.float32),          # running max
                   pltpu.VMEM((1, 1), jnp.float32)]          # running sum-exp

    out = pl.pallas_call(
        kernel,
        out_shape=jax.ShapeDtypeStruct((num_tiles, tn), jnp.float32),
        grid_spec=pltpu.PrefetchScalarGridSpec(
            num_scalar_prefetch=0,
            grid=(num_tiles,),
            in_specs=[
                _full(x),                  # (1, F1+F2) input row, resident
                _full(prep["w12"]),        # block-diag fused linear1/linear2
                _full(prep["b12"]),
                # W3^T streamed per vocab tile (double-buffered DMA).
                # TODO(synk): try pipeline_mode=pl.Buffered(3) for very large V
                # on v5e if DMA issue latency shows up in the trace.
                pl.BlockSpec((256, tn), lambda j: (0, j)),
                _full(prep["b3r"]),        # b3 fully resident (no per-tile DMA)
            ],
            out_specs=pl.BlockSpec((num_tiles, tn), lambda j: (0, 0)),
            scratch_shapes=scratch),
        compiler_params=pltpu.CompilerParams(
            dimension_semantics=("arbitrary",),
            vmem_limit_bytes=prep["vmem_limit_bytes"]),
    )(x, prep["w12"], prep["b12"], prep["w3t"], prep["b3r"])

    # Padded lanes hold -inf; only the first `vocab` entries leave this wrapper.
    return out.reshape(1, v_pad)[:, :vocab]


# --------------------------------------------------------------------------
# References for validation
# --------------------------------------------------------------------------
def _reference_f32(ngram_feat, pinyin_feat, params):
    hp = lax.Precision.HIGHEST
    h1 = jnp.dot(ngram_feat, params["w1"].T, precision=hp) + params["b1"]
    h2 = jnp.dot(pinyin_feat, params["w2"].T, precision=hp) + params["b2"]
    logits = jnp.dot(jnp.concatenate([h1, h2]), params["w3"].T,
                     precision=hp) + params["b3"]
    return jax.nn.log_softmax(logits)[None, :]


def _reference_bf16_mirror(ngram_feat, pinyin_feat, params):
    """Mirrors the kernel's bf16 quantization of h and W3 (f32 accumulation)."""
    hp = lax.Precision.HIGHEST
    h1 = jnp.dot(ngram_feat, params["w1"].T, precision=hp) + params["b1"]
    h2 = jnp.dot(pinyin_feat, params["w2"].T, precision=hp) + params["b2"]
    h = jnp.concatenate([h1, h2]).astype(jnp.bfloat16).astype(jnp.float32)
    w3q = params["w3"].astype(jnp.bfloat16).astype(jnp.float32)
    logits = jnp.dot(h, w3q.T, precision=hp) + params["b3"]
    return jax.nn.log_softmax(logits)[None, :]


if __name__ == "__main__":
    # Small shapes consistent with the module's __init__; vocab deliberately
    # not a multiple of 128 to exercise the padding/masking path.
    ngram_fea_len = 32
    pinyin_fea_len = 48
    vocb_size = 2000

    key = jax.random.PRNGKey(0)
    ks = jax.random.split(key, 8)
    params = {
        "w1": jax.random.normal(ks[0], (128, ngram_fea_len), jnp.float32) * 0.1,
        "b1": jax.random.normal(ks[1], (128,), jnp.float32) * 0.1,
        "w2": jax.random.normal(ks[2], (128, pinyin_fea_len), jnp.float32) * 0.1,
        "b2": jax.random.normal(ks[3], (128,), jnp.float32) * 0.1,
        "w3": jax.random.normal(ks[4], (vocb_size, 256), jnp.float32) * 0.1,
        "b3": jax.random.normal(ks[5], (vocb_size,), jnp.float32) * 0.1,
    }
    ngram_feat = jax.random.normal(ks[6], (ngram_fea_len,), jnp.float32)
    pinyin_feat = jax.random.normal(ks[7], (pinyin_fea_len,), jnp.float32)

    ref_q = _reference_bf16_mirror(ngram_feat, pinyin_feat, params)
    ref_f32 = _reference_f32(ngram_feat, pinyin_feat, params)

    def _check(out):
        assert out.shape == (1, vocb_size), out.shape
        # Proper log-probabilities: exp sums to 1.
        assert jnp.allclose(jnp.sum(jnp.exp(out)), 1.0, atol=1e-3), \
            float(jnp.sum(jnp.exp(out)))
        # Tight check vs. a reference mirroring the kernel's bf16 quantization.
        assert jnp.allclose(out, ref_q, atol=5e-3, rtol=5e-3), \
            float(jnp.max(jnp.abs(out - ref_q)))
        # Looser check vs. the exact f32 module semantics.
        assert jnp.allclose(out, ref_f32, atol=3e-2, rtol=3e-2), \
            float(jnp.max(jnp.abs(out - ref_f32)))

    # Path 1 (default): small vocab -> single fused grid step, all in VMEM.
    prep_single = prepare_params(params)
    out1 = jax.block_until_ready(
        ngram_model_forward(ngram_feat, pinyin_feat, prep_single))
    _check(out1)

    # Path 2: force the streamed-vocab-tile path (resident logits + online LSE
    # + fused normalization) so the large-vocab code runs on small shapes too
    # (2000 -> padded 2048 -> 4 tiles of 512).
    prep_tiled = prepare_params(params, tile_n=512, single_step_vpad_max=0)
    out2 = jax.block_until_ready(
        ngram_model_forward(ngram_feat, pinyin_feat, prep_tiled))
    _check(out2)

    print("KERNEL_OK")
</pallas_src>

<mosaic_0001>
module attributes {stable_mosaic.version = 11 : i64} {
  func.func @kernel(%arg0: i32, %arg1: memref<1x80xf32, #tpu.memory_space<vmem>>, %arg2: memref<80x256xf32, #tpu.memory_space<vmem>>, %arg3: memref<1x256xf32, #tpu.memory_space<vmem>>, %arg4: memref<256x2048xbf16, #tpu.memory_space<vmem>>, %arg5: memref<1x2048xf32, #tpu.memory_space<vmem>>, %arg6: memref<1x2048xf32, #tpu.memory_space<vmem>>) attributes {dimension_semantics = [#tpu.dimension_semantics<arbitrary>], iteration_bounds = array<i64: 1>, scalar_prefetch = 0 : i64, scratch_operands = 0 : i64, tpu.core_type = #tpu.core_type<tc>, window_params = [{pipeline_mode = #tpu.pipeline_mode<synchronous>, transform_indices = @transform_0, window_bounds = array<i64: 1, 80>}, {pipeline_mode = #tpu.pipeline_mode<synchronous>, transform_indices = @transform_1, window_bounds = array<i64: 80, 256>}, {pipeline_mode = #tpu.pipeline_mode<synchronous>, transform_indices = @transform_2, window_bounds = array<i64: 1, 256>}, {transform_indices = @transform_3, window_bounds = array<i64: 256, 2048>}, {pipeline_mode = #tpu.pipeline_mode<synchronous>, transform_indices = @transform_4, window_bounds = array<i64: 1, 2048>}, {pipeline_mode = #tpu.pipeline_mode<synchronous>, transform_indices = @transform_5, window_bounds = array<i64: 1, 2048>}]} {
    %c0 = arith.constant 0 : index
    %c0_0 = arith.constant 0 : index
    %0 = vector.load %arg1[%c0, %c0_0] : memref<1x80xf32, #tpu.memory_space<vmem>>, vector<1x80xf32>
    %c0_1 = arith.constant 0 : index
    %c0_2 = arith.constant 0 : index
    %1 = vector.load %arg2[%c0_1, %c0_2] : memref<80x256xf32, #tpu.memory_space<vmem>>, vector<80x256xf32>
    %cst = arith.constant dense<0.000000e+00> : vector<1x256xf32>
    %2 = tpu.matmul %0, %1, %cst {dimension_numbers = #tpu.dot_dimension_numbers<[1], [0], [0], [1], [0, 0, 1, 1], [], []>} : vector<1x80xf32>, vector<80x256xf32>, vector<1x256xf32> -> vector<1x256xf32>
    %c0_3 = arith.constant 0 : index
    %c0_4 = arith.constant 0 : index
    %3 = vector.load %arg3[%c0_3, %c0_4] : memref<1x256xf32, #tpu.memory_space<vmem>>, vector<1x256xf32>
    %4 = arith.addf %2, %3 : vector<1x256xf32>
    %5 = arith.truncf %4 : vector<1x256xf32> to vector<1x256xbf16>
    %c0_5 = arith.constant 0 : index
    %c0_6 = arith.constant 0 : index
    %6 = vector.load %arg4[%c0_5, %c0_6] : memref<256x2048xbf16, #tpu.memory_space<vmem>>, vector<256x2048xbf16>
    %cst_7 = arith.constant dense<0.000000e+00> : vector<1x2048xf32>
    %7 = tpu.matmul %5, %6, %cst_7 {dimension_numbers = #tpu.dot_dimension_numbers<[1], [0], [0], [1], [0, 0, 1, 1], [], []>} : vector<1x256xbf16>, vector<256x2048xbf16>, vector<1x2048xf32> -> vector<1x2048xf32>
    %c0_8 = arith.constant 0 : index
    %c0_9 = arith.constant 0 : index
    %8 = vector.load %arg5[%c0_8, %c0_9] : memref<1x2048xf32, #tpu.memory_space<vmem>>, vector<1x2048xf32>
    %9 = arith.addf %7, %8 : vector<1x2048xf32>
    %10 = tpu.iota {dimensions = array<i32: 1>} : vector<1x2048xi32>
    %c2000_i32 = arith.constant 2000 : i32
    %11 = vector.broadcast %c2000_i32 : i32 to vector<1x2048xi32>
    %12 = arith.cmpi slt, %10, %11 : vector<1x2048xi32>
    %cst_10 = arith.constant 0xFF800000 : f32
    %13 = vector.broadcast %cst_10 : f32 to vector<1x2048xf32>
    %14 = arith.select %12, %9, %13 : vector<1x2048xi1>, vector<1x2048xf32>
    %cst_11 = arith.constant dense<0xFF800000> : vector<1xf32>
    %15 = vector.multi_reduction <maximumf>, %14, %cst_11 [1] : vector<1x2048xf32> to vector<1xf32>
    %16 = vector.shape_cast %15 : vector<1xf32> to vector<1x1xf32>
    %17 = vector.broadcast %16 : vector<1x1xf32> to vector<1x2048xf32>
    %18 = arith.subf %14, %17 : vector<1x2048xf32>
    %19 = math.exp %18 : vector<1x2048xf32>
    %cst_12 = arith.constant dense<0.000000e+00> : vector<1xf32>
    %20 = vector.multi_reduction <add>, %19, %cst_12 [1] : vector<1x2048xf32> to vector<1xf32>
    %21 = vector.shape_cast %20 : vector<1xf32> to vector<1x1xf32>
    %22 = math.log %21 : vector<1x1xf32>
    %23 = arith.addf %16, %22 : vector<1x1xf32>
    %24 = vector.broadcast %23 : vector<1x1xf32> to vector<1x2048xf32>
    %25 = arith.subf %14, %24 : vector<1x2048xf32>
    %c0_13 = arith.constant 0 : index
    %c0_14 = arith.constant 0 : index
    %26 = vector.load %arg6[%c0_13, %c0_14] : memref<1x2048xf32, #tpu.memory_space<vmem>>, vector<1x2048xf32>
    tpu.vector_store %arg6[%c0_13, %c0_14], %25 {strides = array<i32>} : memref<1x2048xf32, #tpu.memory_space<vmem>>, vector<1x2048xf32>,
    return
  }
  func.func @transform_0(%arg0: i32) -> (i32, i32) {
    %c0_i32 = arith.constant 0 : i32
    %c0_i32_0 = arith.constant 0 : i32
    %c0_i32_1 = arith.constant 0 : i32
    return %c0_i32, %c0_i32_0 : i32, i32
  }
  func.func @transform_1(%arg0: i32) -> (i32, i32) {
    %c0_i32 = arith.constant 0 : i32
    %c0_i32_0 = arith.constant 0 : i32
    %c0_i32_1 = arith.constant 0 : i32
    return %c0_i32, %c0_i32_0 : i32, i32
  }
  func.func @transform_2(%arg0: i32) -> (i32, i32) {
    %c0_i32 = arith.constant 0 : i32
    %c0_i32_0 = arith.constant 0 : i32
    %c0_i32_1 = arith.constant 0 : i32
    return %c0_i32, %c0_i32_0 : i32, i32
  }
  func.func @transform_3(%arg0: i32) -> (i32, i32) {
    %c0_i32 = arith.constant 0 : i32
    %c0_i32_0 = arith.constant 0 : i32
    return %c0_i32, %arg0 : i32, i32
  }
  func.func @transform_4(%arg0: i32) -> (i32, i32) {
    %c0_i32 = arith.constant 0 : i32
    %c0_i32_0 = arith.constant 0 : i32
    %c0_i32_1 = arith.constant 0 : i32
    return %c0_i32, %c0_i32_0 : i32, i32
  }
  func.func @transform_5(%arg0: i32) -> (i32, i32) {
    %c0_i32 = arith.constant 0 : i32
    %c0_i32_0 = arith.constant 0 : i32
    %c0_i32_1 = arith.constant 0 : i32
    return %c0_i32, %c0_i32_0 : i32, i32
  }
}

</mosaic_0001>

<bundles_post_ra>
// kernel: tpu_custom_call.1
= control target key start
LH: loop header
LB: loop body
LE: loop exit
PB: predicated region body
PF: predicated region fallthrough
CT: control target
= control target key end

     0   :  { %10 = vsyncpa [#allocation3], 0  ;;  %s4149_s0 = inlined_call_operand.hbm [shape: f32[1,80], index: 0, kind: input, shape index: {}]   ;;  %s4150_s1 = inlined_call_operand.hbm [shape: f32[80,256], index: 1, kind: input, shape index: {}]   ;;  %s4151_s2 = inlined_call_operand.hbm [shape: f32[1,256], index: 2, kind: input, shape index: {}]   ;;  %s4152_s3 = inlined_call_operand.hbm [shape: bf16[256,2048], index: 3, kind: input, shape index: {}]   ;;  %s4153_s4 = inlined_call_operand.hbm [shape: f32[1,2048], index: 4, kind: input, shape index: {}]   ;;  %s4154_s5 = inlined_call_operand.hbm [shape: f32[1,2048], index: 5, kind: output, shape index: {}]  }
   0x1   :  { %11 = vsyncpa [#allocation6], 0 }
   0x2   :  { %12 = vsyncpa [#allocation9], 0  ;;  %s29_s20 = sshll.u32 %s4150_s1, 4  ;;  %s30_s20 = int_to_ptr.hbm [resolvable:$true] %s29_s20 }
   0x3   :  { %13 = vsyncpa [#allocation4], 0  ;;  %s3888_s21 = smov [#allocation5]   ;;  %s53_s25 = sshll.u32 %s4152_s3, 4  ;;  %s54_s25 = int_to_ptr.hbm [resolvable:$true] %s53_s25 }
   0x4   :  { %s31_s22 = sshll.u32 %s3888_s21, 4  ;;  %s3889_s26 = smov 256   ;;  %s32_s22 = int_to_ptr.vmem [resolvable:$true] %s31_s22 }
   0x5   :  { %s3890_s27 = smov 16   ;;  %s3891_s28 = smov [#allocation8]  }
   0x6   :  { %37 = dma.hbm_to_vmem [thread:$0]  %s30_s20, 2560, %s32_s22, [#allocation6], %s3889_s26, %s3889_s26, %s3890_s27  }
   0x7   :  { %s55_s29 = sshll.u32 %s3891_s28, 4  ;;  %s3892_s30 = smov 1024   ;;  %s56_s29 = int_to_ptr.vmem [resolvable:$true] %s55_s29 }
   0x8   :  { %s3893_s6 = smov 64   ;;  %s19_s8 = sshll.u32 %s4149_s0, 4  ;;  %s20_s8 = int_to_ptr.hbm [resolvable:$true] %s19_s8 }
   0x9   :  { %61 = dma.hbm_to_vmem [thread:$0]  %s54_s25, 32768, %s56_s29, [#allocation9], %s3892_s30, %s3892_s30, %s3893_s6  }
   0xa   :  { %s3894_s9 = smov [#allocation2]   ;;  %s43_s12 = sshll.u32 %s4151_s2, 4  ;;  %s44_s12 = int_to_ptr.hbm [resolvable:$true] %s43_s12 }
   0xb   :  { %s21_s10 = sshll.u32 %s3894_s9, 4  ;;  %s3895_s13 = smov [#allocation7]   ;;  %s22_s10 = int_to_ptr.vmem [resolvable:$true] %s21_s10 }
   0xc   :  { %24 = dma.hbm_to_vmem [thread:$0]  %s20_s8, 16, %s22_s10, [#allocation3]  }
   0xd   :  { %s45_s14 = sshll.u32 %s3895_s13, 4  ;;  %s67_s17 = sshll.u32 %s4153_s4, 4  ;;  %s46_s14 = int_to_ptr.vmem [resolvable:$true] %s45_s14  ;;  %s68_s17 = int_to_ptr.hbm [resolvable:$true] %s67_s17 }
   0xe   :  { %48 = dma.hbm_to_vmem [thread:$0]  %s44_s12, 32, %s46_s14, [#allocation6]  }
   0xf   :  { %s3896_s0 = smov [#allocation10]  }
  0x10   :  { %s69_s18 = sshll.u32 %s3896_s0, 4  ;;  %s70_s18 = int_to_ptr.vmem [resolvable:$true] %s69_s18 }
  0x11   :  { %72 = dma.hbm_to_vmem [thread:$0]  %s68_s17, 256, %s70_s18, [#allocation9]  }
  0x12   :  { %3880 = dma.done.wait [#allocation3], 16  }
  0x13   :  { %3881 = vsyncadd [#allocation3], 4294967280 }
  0x14   :  { %3882 = dma.done.wait [#allocation6], 2592  }
  0x15   :  { %3883 = vsyncadd [#allocation6], 4294964704 }
  0x16   :  { %3884 = dma.done.wait [#allocation9], 33024  }
  0x17   :  { %3885 = vsyncadd [#allocation9], 4294934272  ;;  %v112_v0 = vld [vmem:[#allocation5 + $0x90] sm:$0xff]  ;;  %v113_v1 = vld [vmem:[#allocation5 + $0x98] sm:$0xff]  ;;  %vm120_vm0 = vcmask 654336   ;;  %vm2203_vm1 = vcmask 1040384  }
  0x18   :  { %v110_v2 = vld [vmem:[#allocation5 + $0x80] sm:$0xff]  ;;  %130 = vmatpush.msra.mxu0 %v112_v0  ;;  %150 = vmatpush.msra.mxu1 %v113_v1  ;;  %v111_v3 = vld [vmem:[#allocation5 + $0x88] sm:$0xff]  ;;  %v108_v4 = vld [vmem:[#allocation5 + $0x70] sm:$0xff]  ;;  %vm2368_vm3 = vcmask 1042434   ;;  %vm2370_vm4 = vcmask 1041408   ;;  %vm2372_vm5 = vcmask 1044484  }
  0x19   :  { %v109_v5 = vld [vmem:[#allocation5 + $0x78] sm:$0xff]  ;;  %v106_v6 = vld [vmem:[#allocation5 + $0x60] sm:$0xff]  ;;  %v107_v7 = vld [vmem:[#allocation5 + $0x68] sm:$0xff]  ;;  %vm2374_vm6 = vcmask 1046534   ;;  %vm2376_vm7 = vcmask 1045508   ;;  %vm2378_vm8 = vcmask 1043456  }
  0x1a   :  { %131 = vmatpush.msra.mxu0 %v110_v2  ;;  %151 = vmatpush.msra.mxu1 %v111_v3  ;;  %v104_v8 = vld [vmem:[#allocation5 + $0x50] sm:$0xff]  ;;  %v105_v9 = vld [vmem:[#allocation5 + $0x58] sm:$0xff]  ;;  %v2862_v10 = vld [vmem:[#allocation8 + $0x380] sm:$0xf]  ;;  %s3897_s2 = smov [#allocation11]   ;;  %s2398_s21 = sshll.u32 %s4154_s5, 4  ;;  %s2399_s21 = int_to_ptr.hbm [resolvable:$true] %s2398_s21 }
  0x1b   :  { %v3556_v11 = vld [vmem:[#allocation8 + $0x3bc] sm:$0xf0]  ;;  %v103_v14 = vld [vmem:[#allocation5 + $0x48] sm:$0xff]  ;;  %v100_v17 = vld [vmem:[#allocation5 + $0x30] sm:$0xff]  ;;  %s2396_s4 = sshll.u32 %s3897_s2, 4  ;;  %s2397_s4 = int_to_ptr.vmem [resolvable:$true] %s2396_s4 }
  0x1c   :  { %132 = vmatpush.msra.mxu0 %v108_v4  ;;  %152 = vmatpush.msra.mxu1 %v109_v5  ;;  %v3374_v12 = vld [vmem:[#allocation8 + $0x780] sm:$0xf]  ;;  %v2863_v15 = vor.u32 %v3556_v11, %v2862_v10  ;;  %v101_v18 = vld [vmem:[#allocation5 + $0x38] sm:$0xff]  ;;  %v99_v25 = vld [vmem:[#allocation5 + $0x28] sm:$0xff] }
  0x1d   :  { %v102_v13 = vld [vmem:[#allocation5 + $0x40] sm:$0xff]  ;;  %v96_v27 = vld [vmem:[#allocation5 + $0x10] sm:$0xff]  ;;  %v97_v31 = vld [vmem:[#allocation5 + $0x18] sm:$0xff] }
  0x1e   :  { %133 = vmatpush.msra.mxu0 %v106_v6  ;;  %153 = vmatpush.msra.mxu1 %v107_v7  ;;  %v3684_v16 = vld [vmem:[#allocation8 + $0x7bc] sm:$0xf0]  ;;  %v3548_v32 = vld [vmem:[#allocation8 + $0x384] sm:$0xf]  ;;  %v93_v43 = vld [vmem:[#allocation2] sm:$0x1] }
  0x1f   :  { %v3375_v19 = vor.u32 %v3684_v16, %v3374_v12  ;;  %v2798_v20 = vld [vmem:[#allocation8 + $0x300] sm:$0xf]  ;;  %1738 = vmatpush.bf16.msra.mxu2 %v2863_v15  ;;  %v2864_v33 = vld [vmem:[#allocation8 + $0x3c0] sm:$0xf0] }
  0x20   :  { %134 = vmatpush.msra.mxu0 %v104_v8  ;;  %154 = vmatpush.msra.mxu1 %v105_v9  ;;  %v3540_v21 = vld [vmem:[#allocation8 + $0x33c] sm:$0xf0]  ;;  %v3676_v34 = vld [vmem:[#allocation8 + $0x784] sm:$0xf]  ;;  %v2867_v44 = vor.u32 %v3548_v32, %v2864_v33 }
  0x21   :  { %v3310_v22 = vld [vmem:[#allocation8 + $0x700] sm:$0xf]  ;;  %v2799_v26 = vor.u32 %v3540_v21, %v2798_v20  ;;  %1751 = vmatpush.bf16.msra.mxu3 %v3375_v19  ;;  %v3376_v35 = vld [vmem:[#allocation8 + $0x7c0] sm:$0xf0] }
  0x22   :  { %v3668_v23 = vld [vmem:[#allocation8 + $0x73c] sm:$0xf0]  ;;  %135 = vmatpush.msra.mxu0 %v102_v13  ;;  %155 = vmatpush.msra.mxu1 %v103_v14  ;;  %v95_v42 = vld [vmem:[#allocation5 + $0x8] sm:$0xff]  ;;  %v3379_v45 = vor.u32 %v3676_v34, %v3376_v35 }
  0x23   :  { %v98_v24 = vld [vmem:[#allocation5 + $0x20] sm:$0xff]  ;;  %v3311_v28 = vor.u32 %v3668_v23, %v3310_v22  ;;  %1739 = vmatpush.bf16.msra.mxu2 %v2799_v26 }
  0x24   :  { %v2734_v29 = vld [vmem:[#allocation8 + $0x280] sm:$0xf]  ;;  %136 = vmatpush.msra.mxu0 %v100_v17  ;;  %156 = vmatpush.msra.mxu1 %v101_v18  ;;  %v3532_v46 = vld [vmem:[#allocation8 + $0x304] sm:$0xf] }
  0x25   :  { %v3524_v30 = vld [vmem:[#allocation8 + $0x2bc] sm:$0xf0]  ;;  %1752 = vmatpush.bf16.msra.mxu3 %v3311_v28  ;;  %v2800_v47 = vld [vmem:[#allocation8 + $0x340] sm:$0xf0]  ;;  %v2870_v28 = vld [vmem:[#allocation8 + $0x388] sm:$0xf] }
  0x26   :  { %v2735_v36 = vor.u32 %v3524_v30, %v2734_v29  ;;  %v3246_v37 = vld [vmem:[#allocation8 + $0x680] sm:$0xf]  ;;  %137 = vmatpush.msra.mxu0 %v98_v24  ;;  %157 = vmatpush.msra.mxu1 %v99_v25  ;;  %v3660_v48 = vld [vmem:[#allocation8 + $0x704] sm:$0xf]  ;;  %v2803_v56 = vor.u32 %v3532_v46, %v2800_v47  ;;  %v3557_v29 = vld [vmem:[#allocation8 + $0x3c4] sm:$0xf0] }
  0x27   :  { %v3652_v38 = vld [vmem:[#allocation8 + $0x6bc] sm:$0xf0]  ;;  %v3312_v49 = vld [vmem:[#allocation8 + $0x740] sm:$0xf0] }
  0x28   :  { %v2670_v39 = vld [vmem:[#allocation8 + $0x200] sm:$0xf]  ;;  %138 = vmatpush.msra.mxu0 %v96_v27  ;;  %158 = vmatpush.msra.mxu1 %v97_v31  ;;  %v3247_v50 = vor.u32 %v3652_v38, %v3246_v37  ;;  %v3315_v57 = vor.u32 %v3660_v48, %v3312_v49  ;;  %v3516_v58 = vld [vmem:[#allocation8 + $0x284] sm:$0xf] }
  0x29   :  { %v3508_v40 = vld [vmem:[#allocation8 + $0x23c] sm:$0xf0]  ;;  %1740 = vmatpush.bf16.msra.mxu2 %v2735_v36  ;;  %v2736_v59 = vld [vmem:[#allocation8 + $0x2c0] sm:$0xf0] }
  0x2a   :  { %v94_v41 = vld [vmem:[#allocation5] sm:$0xff]  ;;  %v2671_v51 = vor.u32 %v3508_v40, %v2670_v39  ;;  %159 = vmatpush.msra.mxu1 %v95_v42  ;;  %1753 = vmatpush.bf16.msra.mxu3 %v3247_v50  ;;  %v2739_v4 = vor.u32 %v3516_v58, %v2736_v59  ;;  %v2871_v40 = vor.u32 %v3557_v29, %v2870_v28  ;;  %v3685_v42 = vld [vmem:[#allocation8 + $0x7c4] sm:$0xf0]  ;;  %v3645_v28 = vld [vmem:[#allocation8 + $0x68c] sm:$0xf] }
  0x2b   :  { %v3182_v52 = vld [vmem:[#allocation8 + $0x600] sm:$0xf]  ;;  %139 = vmatpush.msra.mxu0 %v94_v41  ;;  %2411 = vmatmul.msk.f32.vlgmr.msra.gmra.mxu1 %vm120_vm0, %v93_v43  ;;  %v3644_v60 = vld [vmem:[#allocation8 + $0x684] sm:$0xf]  ;;  %v3382_v41 = vld [vmem:[#allocation8 + $0x788] sm:$0xf] }
  0x2c   :  { %v3636_v53 = vld [vmem:[#allocation8 + $0x63c] sm:$0xf0]  ;;  %2410 = vmatmul.msk.f32.vlgmr.msra.gmra.mxu0 %vm120_vm0, %v93_v43  ;;  %1777 = vmatpush.bf16.msrb.mxu1 %v3379_v45  ;;  %v3248_v61 = vld [vmem:[#allocation8 + $0x6c0] sm:$0xf0]  ;;  %v2806_v43 = vld [vmem:[#allocation8 + $0x308] sm:$0xf] }
  0x2d   :  { %v2606_v54 = vld [vmem:[#allocation8 + $0x180] sm:$0xf]  ;;  %1764 = vmatpush.bf16.msrb.mxu0 %v2867_v44  ;;  %1741 = vmatpush.bf16.msra.mxu2 %v2671_v51  ;;  %v3183_v62 = vor.u32 %v3636_v53, %v3182_v52  ;;  %v3251_v5 = vor.u32 %v3644_v60, %v3248_v61  ;;  %v3500_v6 = vld [vmem:[#allocation8 + $0x204] sm:$0xf]  ;;  %v3541_v44 = vld [vmem:[#allocation8 + $0x344] sm:$0xf0]  ;;  %v3383_v52 = vor.u32 %v3685_v42, %v3382_v41 }
  0x2e   :  { %v3492_v55 = vld [vmem:[#allocation8 + $0x1bc] sm:$0xf0]  ;;  %v2672_v7 = vld [vmem:[#allocation8 + $0x240] sm:$0xf0]  ;;  %v2807_v53 = vor.u32 %v3541_v44, %v2806_v43  ;;  %v3256_v29 = vld [vmem:[#allocation8 + $0x6c8] sm:$0xf0] }
  0x2f   :  { %v2607_v63 = vor.u32 %v3492_v55, %v2606_v54  ;;  %v3118_v0 = vld [vmem:[#allocation8 + $0x580] sm:$0xf]  ;;  %1754 = vmatpush.bf16.msra.mxu3 %v3183_v62  ;;  %v3628_v8 = vld [vmem:[#allocation8 + $0x604] sm:$0xf]  ;;  %v2675_v16 = vor.u32 %v3500_v6, %v2672_v7  ;;  %v3318_v54 = vld [vmem:[#allocation8 + $0x708] sm:$0xf] }
  0x30   :  { %v3620_v1 = vld [vmem:[#allocation8 + $0x5bc] sm:$0xf0]  ;;  %1778 = vmatpush.bf16.msrb.mxu1 %v3315_v57  ;;  %v3184_v9 = vld [vmem:[#allocation8 + $0x640] sm:$0xf0]  ;;  %v3669_v55 = vld [vmem:[#allocation8 + $0x744] sm:$0xf0] }
  0x31   :  { %v2542_v2 = vld [vmem:[#allocation8 + $0x100] sm:$0xf]  ;;  %1765 = vmatpush.bf16.msrb.mxu0 %v2803_v56  ;;  %1742 = vmatpush.bf16.msra.mxu2 %v2607_v63  ;;  %v3119_v10 = vor.u32 %v3620_v1, %v3118_v0  ;;  %v3187_v17 = vor.u32 %v3628_v8, %v3184_v9  ;;  %v3484_v18 = vld [vmem:[#allocation8 + $0x184] sm:$0xf]  ;;  %v2742_v56 = vld [vmem:[#allocation8 + $0x288] sm:$0xf] }
  0x32   :  { %v3476_v3 = vld [vmem:[#allocation8 + $0x13c] sm:$0xf0]  ;;  %v2608_v19 = vld [vmem:[#allocation8 + $0x1c0] sm:$0xf0]  ;;  %v3525_v57 = vld [vmem:[#allocation8 + $0x2c4] sm:$0xf0] }
  0x33   :  { %v2543_v11 = vor.u32 %v3476_v3, %v2542_v2  ;;  %v3054_v12 = vld [vmem:[#allocation8 + $0x500] sm:$0xf]  ;;  %1755 = vmatpush.bf16.msra.mxu3 %v3119_v10  ;;  %v3612_v20 = vld [vmem:[#allocation8 + $0x584] sm:$0xf]  ;;  %v2611_v30 = vor.u32 %v3484_v18, %v2608_v19  ;;  %v3549_v0 = vld [vmem:[#allocation8 + $0x38c] sm:$0xf] }
  0x34   :  { %v3604_v13 = vld [vmem:[#allocation8 + $0x53c] sm:$0xf0]  ;;  %1779 = vmatpush.bf16.msrb.mxu1 %v3251_v5  ;;  %v3120_v21 = vld [vmem:[#allocation8 + $0x5c0] sm:$0xf0]  ;;  %v2872_v1 = vld [vmem:[#allocation8 + $0x3c8] sm:$0xf0]  ;;  %v2743_v5 = vor.u32 %v3525_v57, %v2742_v56 }
  0x35   :  { %v2478_v14 = vld [vmem:[#allocation8 + $0x80] sm:$0xf]  ;;  %1766 = vmatpush.bf16.msrb.mxu0 %v2739_v4  ;;  %1743 = vmatpush.bf16.msra.mxu2 %v2543_v11  ;;  %v3055_v22 = vor.u32 %v3604_v13, %v3054_v12  ;;  %v3123_v31 = vor.u32 %v3612_v20, %v3120_v21  ;;  %v3468_v32 = vld [vmem:[#allocation8 + $0x104] sm:$0xf]  ;;  %v3677_v2 = vld [vmem:[#allocation8 + $0x78c] sm:$0xf]  ;;  %v3319_v4 = vor.u32 %v3669_v55, %v3318_v54 }
  0x36   :  { %v3460_v15 = vld [vmem:[#allocation8 + $0xbc] sm:$0xf0]  ;;  %v2544_v33 = vld [vmem:[#allocation8 + $0x140] sm:$0xf0]  ;;  %v3384_v3 = vld [vmem:[#allocation8 + $0x7c8] sm:$0xf0]  ;;  %v2875_v12 = vor.u32 %v3549_v0, %v2872_v1 }
  0x37   :  { %v2479_v23 = vor.u32 %v3460_v15, %v2478_v14  ;;  %v2990_v24 = vld [vmem:[#allocation8 + $0x480] sm:$0xf]  ;;  %1756 = vmatpush.bf16.msra.mxu3 %v3055_v22  ;;  %v3596_v34 = vld [vmem:[#allocation8 + $0x504] sm:$0xf]  ;;  %v2547_v45 = vor.u32 %v3468_v32, %v2544_v33  ;;  %v3254_v6 = vld [vmem:[#allocation8 + $0x688] sm:$0xf]  ;;  %v3387_v13 = vor.u32 %v3677_v2, %v3384_v3 }
  0x38   :  { %v3588_v25 = vld [vmem:[#allocation8 + $0x4bc] sm:$0xf0]  ;;  %1780 = vmatpush.bf16.msrb.mxu1 %v3187_v17  ;;  %v3056_v35 = vld [vmem:[#allocation8 + $0x540] sm:$0xf0]  ;;  %v3653_v7 = vld [vmem:[#allocation8 + $0x6c4] sm:$0xf0] }
  0x39   :  { %v2414_v26 = vld [vmem:[#allocation8] sm:$0xf]  ;;  %1767 = vmatpush.bf16.msrb.mxu0 %v2675_v16  ;;  %1744 = vmatpush.bf16.msra.mxu2 %v2479_v23  ;;  %v2991_v36 = vor.u32 %v3588_v25, %v2990_v24  ;;  %v3059_v46 = vor.u32 %v3596_v34, %v3056_v35  ;;  %v3452_v47 = vld [vmem:[#allocation8 + $0x84] sm:$0xf]  ;;  %v2678_v8 = vld [vmem:[#allocation8 + $0x208] sm:$0xf]  ;;  %v3255_v18 = vor.u32 %v3653_v7, %v3254_v6 }
  0x3a   :  { %v3444_v27 = vld [vmem:[#allocation8 + $0x3c] sm:$0xf0]  ;;  %v2480_v48 = vld [vmem:[#allocation8 + $0xc0] sm:$0xf0]  ;;  %v3509_v9 = vld [vmem:[#allocation8 + $0x244] sm:$0xf0] }
  0x3b   :  { %v2415_v37 = vor.u32 %v3444_v27, %v2414_v26  ;;  %v2926_v38 = vld [vmem:[#allocation8 + $0x400] sm:$0xf]  ;;  %1757 = vmatpush.bf16.msra.mxu3 %v2991_v36  ;;  %v3580_v49 = vld [vmem:[#allocation8 + $0x484] sm:$0xf]  ;;  %v2483_v58 = vor.u32 %v3452_v47, %v2480_v48  ;;  %v3533_v14 = vld [vmem:[#allocation8 + $0x30c] sm:$0xf]  ;;  %v2679_v19 = vor.u32 %v3509_v9, %v2678_v8 }
  0x3c   :  { %v3572_v39 = vld [vmem:[#allocation8 + $0x43c] sm:$0xf0]  ;;  %1781 = vmatpush.bf16.msrb.mxu1 %v3123_v31  ;;  %v2992_v50 = vld [vmem:[#allocation8 + $0x4c0] sm:$0xf0]  ;;  %v2808_v15 = vld [vmem:[#allocation8 + $0x348] sm:$0xf0] }
  0x3d   :  { %1768 = vmatpush.bf16.msrb.mxu0 %v2611_v30  ;;  %1745 = vmatpush.bf16.msra.mxu2 %v2415_v37  ;;  %v2927_v51 = vor.u32 %v3572_v39, %v2926_v38  ;;  %v2995_v59 = vor.u32 %v3580_v49, %v2992_v50  ;;  %v3436_v60 = vld [vmem:[#allocation8 + $0x4] sm:$0xf]  ;;  %v3661_v16 = vld [vmem:[#allocation8 + $0x70c] sm:$0xf]  ;;  %v3190_v20 = vld [vmem:[#allocation8 + $0x608] sm:$0xf]  ;;  %v2811_v24 = vor.u32 %v3533_v14, %v2808_v15 }
  0x3e   :  { %v2416_v61 = vld [vmem:[#allocation8 + $0x40] sm:$0xf0]  ;;  %v3320_v17 = vld [vmem:[#allocation8 + $0x748] sm:$0xf0]  ;;  %v3637_v21 = vld [vmem:[#allocation8 + $0x644] sm:$0xf0]  ;;  %v3259_v37 = vor.u32 %v3645_v28, %v3256_v29 }
  0x3f   :  { %v3564_v62 = vld [vmem:[#allocation8 + $0x404] sm:$0xf]  ;;  %1758 = vmatpush.bf16.msra.mxu3 %v2927_v51  ;;  %v2419_v10 = vor.u32 %v3436_v60, %v2416_v61  ;;  %v2614_v22 = vld [vmem:[#allocation8 + $0x188] sm:$0xf]  ;;  %v3323_v25 = vor.u32 %v3661_v16, %v3320_v17  ;;  %v3517_v26 = vld [vmem:[#allocation8 + $0x28c] sm:$0xf]  ;;  %v3191_v30 = vor.u32 %v3637_v21, %v3190_v20 }
  0x40   :  { %1782 = vmatpush.bf16.msrb.mxu1 %v3059_v46  ;;  %v2928_v63 = vld [vmem:[#allocation8 + $0x440] sm:$0xf0]  ;;  %v3493_v23 = vld [vmem:[#allocation8 + $0x1c4] sm:$0xf0]  ;;  %v2744_v27 = vld [vmem:[#allocation8 + $0x2c8] sm:$0xf0] }
  0x41   :  { %1790 = vmatpush.bf16.msrb.mxu2 %v2871_v40  ;;  %1769 = vmatpush.bf16.msrb.mxu0 %v2547_v45  ;;  %v2931_v11 = vor.u32 %v3564_v62, %v2928_v63  ;;  %v2615_v31 = vor.u32 %v3493_v23, %v2614_v22  ;;  %v3126_v32 = vld [vmem:[#allocation8 + $0x588] sm:$0xf]  ;;  %v2747_v36 = vor.u32 %v3517_v26, %v2744_v27  ;;  %v3501_v38 = vld [vmem:[#allocation8 + $0x20c] sm:$0xf]  ;;  %v114_v21 = vld [vmem:[#allocation7] sm:$0x3] }
  0x42   :  { %v3621_v33 = vld [vmem:[#allocation8 + $0x5c4] sm:$0xf0]  ;;  %v2680_v39 = vld [vmem:[#allocation8 + $0x248] sm:$0xf0]  ;;  %v116_v22 = vperm.slane %v114_v21, 0  ;;  %v117_v23 = vperm.slane %v114_v21, 1 }
  0x43   :  { %1803 = vmatpush.bf16.msrb.mxu3 %v3383_v52  ;;  %v2550_v34 = vld [vmem:[#allocation8 + $0x108] sm:$0xf]  ;;  %v3629_v40 = vld [vmem:[#allocation8 + $0x60c] sm:$0xf]  ;;  %v3127_v42 = vor.u32 %v3621_v33, %v3126_v32  ;;  %v2683_v46 = vor.u32 %v3501_v38, %v2680_v39  ;;  %v3390_v28 = vld [vmem:[#allocation8 + $0x790] sm:$0xf] }
  0x44   :  { %1783 = vmatpush.bf16.msrb.mxu1 %v2995_v59  ;;  %v3477_v35 = vld [vmem:[#allocation8 + $0x144] sm:$0xf0]  ;;  %v3192_v41 = vld [vmem:[#allocation8 + $0x648] sm:$0xf0]  ;;  %v3686_v29 = vld [vmem:[#allocation8 + $0x7cc] sm:$0xf0] }
  0x45   :  { %1791 = vmatpush.bf16.msrb.mxu2 %v2807_v53  ;;  %1770 = vmatpush.bf16.msrb.mxu0 %v2483_v58  ;;  %v2551_v43 = vor.u32 %v3477_v35, %v2550_v34  ;;  %v3062_v44 = vld [vmem:[#allocation8 + $0x508] sm:$0xf]  ;;  %v3195_v47 = vor.u32 %v3629_v40, %v3192_v41  ;;  %v3485_v48 = vld [vmem:[#allocation8 + $0x18c] sm:$0xf]  ;;  %v2880_v33 = vld [vmem:[#allocation8 + $0x3d0] sm:$0xf0]  ;;  %v3391_v39 = vor.u32 %v3686_v29, %v3390_v28 }
  0x46   :  { %v3605_v45 = vld [vmem:[#allocation8 + $0x544] sm:$0xf0]  ;;  %v2616_v49 = vld [vmem:[#allocation8 + $0x1c8] sm:$0xf0]  ;;  %v3678_v34 = vld [vmem:[#allocation8 + $0x794] sm:$0xf] }
  0x47   :  { %1804 = vmatpush.bf16.msrb.mxu3 %v3319_v4  ;;  %v3613_v50 = vld [vmem:[#allocation8 + $0x58c] sm:$0xf]  ;;  %v3063_v52 = vor.u32 %v3605_v45, %v3062_v44  ;;  %v2619_v53 = vor.u32 %v3485_v48, %v2616_v49  ;;  %v2486_v61 = vld [vmem:[#allocation8 + $0x88] sm:$0xf]  ;;  %v3392_v35 = vld [vmem:[#allocation8 + $0x7d0] sm:$0xf0] }
  0x48   :  { %1784 = vmatpush.bf16.msrb.mxu1 %v2931_v11  ;;  %v3128_v51 = vld [vmem:[#allocation8 + $0x5c8] sm:$0xf0]  ;;  %v3461_v62 = vld [vmem:[#allocation8 + $0xc4] sm:$0xf0]  ;;  %v2814_v40 = vld [vmem:[#allocation8 + $0x310] sm:$0xf] }
  0x49   :  { %1792 = vmatpush.bf16.msrb.mxu2 %v2743_v5  ;;  %1771 = vmatpush.bf16.msrb.mxu0 %v2419_v10  ;;  %v3131_v54 = vor.u32 %v3613_v50, %v3128_v51  ;;  %v3469_v55 = vld [vmem:[#allocation8 + $0x10c] sm:$0xf]  ;;  %v2998_v63 = vld [vmem:[#allocation8 + $0x488] sm:$0xf]  ;;  %v2487_v0 = vor.u32 %v3461_v62, %v2486_v61  ;;  %v3542_v41 = vld [vmem:[#allocation8 + $0x34c] sm:$0xf0] }
  0x4a   :  { %v2552_v56 = vld [vmem:[#allocation8 + $0x148] sm:$0xf0]  ;;  %v3589_v1 = vld [vmem:[#allocation8 + $0x4c4] sm:$0xf0]  ;;  %v3326_v44 = vld [vmem:[#allocation8 + $0x710] sm:$0xf]  ;;  %v2815_v50 = vor.u32 %v3542_v41, %v2814_v40 }
  0x4b   :  { %1805 = vmatpush.bf16.msrb.mxu3 %v3255_v18  ;;  %v3597_v57 = vld [vmem:[#allocation8 + $0x50c] sm:$0xf]  ;;  %v2555_v59 = vor.u32 %v3469_v55, %v2552_v56  ;;  %v2999_v4 = vor.u32 %v3589_v1, %v2998_v63  ;;  %v2422_v9 = vld [vmem:[#allocation8 + $0x8] sm:$0xf]  ;;  %v3670_v45 = vld [vmem:[#allocation8 + $0x74c] sm:$0xf0] }
  0x4c   :  { %1829 = vmatpush.bf16.msra.mxu1 %v3387_v13  ;;  %v3064_v58 = vld [vmem:[#allocation8 + $0x548] sm:$0xf0]  ;;  %v3445_v10 = vld [vmem:[#allocation8 + $0x44] sm:$0xf0]  ;;  %v3662_v48 = vld [vmem:[#allocation8 + $0x714] sm:$0xf]  ;;  %v3327_v51 = vor.u32 %v3670_v45, %v3326_v44 }
  0x4d   :  { %1816 = vmatpush.bf16.msra.mxu0 %v2875_v12  ;;  %1793 = vmatpush.bf16.msrb.mxu2 %v2679_v19  ;;  %v3067_v60 = vor.u32 %v3597_v57, %v3064_v58  ;;  %v3453_v2 = vld [vmem:[#allocation8 + $0x8c] sm:$0xf]  ;;  %v2934_v11 = vld [vmem:[#allocation8 + $0x408] sm:$0xf]  ;;  %v2423_v12 = vor.u32 %v3445_v10, %v2422_v9  ;;  %v3328_v49 = vld [vmem:[#allocation8 + $0x750] sm:$0xf0] }
  0x4e   :  { %v2488_v3 = vld [vmem:[#allocation8 + $0xc8] sm:$0xf0]  ;;  %v3573_v13 = vld [vmem:[#allocation8 + $0x444] sm:$0xf0]  ;;  %v3331_v55 = vor.u32 %v3662_v48, %v3328_v49  ;;  %v3262_v56 = vld [vmem:[#allocation8 + $0x690] sm:$0xf] }
  0x4f   :  { %1806 = vmatpush.bf16.msrb.mxu3 %v3191_v30  ;;  %v2491_v5 = vor.u32 %v3453_v2, %v2488_v3  ;;  %v3581_v6 = vld [vmem:[#allocation8 + $0x48c] sm:$0xf]  ;;  %v2935_v16 = vor.u32 %v3573_v13, %v2934_v11  ;;  %v3550_v30 = vld [vmem:[#allocation8 + $0x394] sm:$0xf]  ;;  %v3654_v57 = vld [vmem:[#allocation8 + $0x6cc] sm:$0xf0] }
  0x50   :  { %1830 = vmatpush.bf16.msra.mxu1 %v3323_v25  ;;  %v3000_v7 = vld [vmem:[#allocation8 + $0x4c8] sm:$0xf0]  ;;  %v3558_v25 = vld [vmem:[#allocation8 + $0x3cc] sm:$0xf0]  ;;  %v3518_v58 = vld [vmem:[#allocation8 + $0x294] sm:$0xf]  ;;  %v3263_v63 = vor.u32 %v3654_v57, %v3262_v56 }
  0x51   :  { %1817 = vmatpush.bf16.msra.mxu0 %v2811_v24  ;;  %1794 = vmatpush.bf16.msrb.mxu2 %v2615_v31  ;;  %v3003_v8 = vor.u32 %v3581_v6, %v3000_v7  ;;  %v3437_v14 = vld [vmem:[#allocation8 + $0xc] sm:$0xf]  ;;  %v2878_v24 = vld [vmem:[#allocation8 + $0x390] sm:$0xf]  ;;  %v3264_v61 = vld [vmem:[#allocation8 + $0x6d0] sm:$0xf0] }
  0x52   :  { %v2424_v15 = vld [vmem:[#allocation8 + $0x48] sm:$0xf0]  ;;  %v2879_v38 = vor.u32 %v3558_v25, %v2878_v24  ;;  %v3510_v1 = vld [vmem:[#allocation8 + $0x24c] sm:$0xf0]  ;;  %v3502_v6 = vld [vmem:[#allocation8 + $0x214] sm:$0xf] }
  0x53   :  { %1807 = vmatpush.bf16.msrb.mxu3 %v3127_v42  ;;  %v2427_v17 = vor.u32 %v3437_v14, %v2424_v15  ;;  %v3565_v18 = vld [vmem:[#allocation8 + $0x40c] sm:$0xf]  ;;  %v2883_v42 = vor.u32 %v3550_v30, %v2880_v33  ;;  %v2688_v7 = vld [vmem:[#allocation8 + $0x250] sm:$0xf0]  ;;  %v3494_v13 = vld [vmem:[#allocation8 + $0x1cc] sm:$0xf0] }
  0x54   :  { %1831 = vmatpush.bf16.msra.mxu1 %v3259_v37  ;;  %v2936_v19 = vld [vmem:[#allocation8 + $0x448] sm:$0xf0]  ;;  %v3200_v9 = vld [vmem:[#allocation8 + $0x650] sm:$0xf0]  ;;  %v2691_v14 = vor.u32 %v3502_v6, %v2688_v7  ;;  %v2558_v24 = vld [vmem:[#allocation8 + $0x110] sm:$0xf] }
  0x55   :  { %1818 = vmatpush.bf16.msra.mxu0 %v2747_v36  ;;  %1795 = vmatpush.bf16.msrb.mxu2 %v2551_v43  ;;  %v2939_v20 = vor.u32 %v3565_v18, %v2936_v19  ;;  %v3395_v43 = vor.u32 %v3678_v34, %v3392_v35  ;;  %v3486_v18 = vld [vmem:[#allocation8 + $0x194] sm:$0xf]  ;;  %v3478_v25 = vld [vmem:[#allocation8 + $0x14c] sm:$0xf0] }
  0x56   :  { %v2624_v19 = vld [vmem:[#allocation8 + $0x1d0] sm:$0xf0]  ;;  %v3070_v28 = vld [vmem:[#allocation8 + $0x510] sm:$0xf]  ;;  %v2559_v34 = vor.u32 %v3478_v25, %v2558_v24 }
  0x57   :  { %1808 = vmatpush.bf16.msrb.mxu3 %v3063_v52  ;;  %v2750_v52 = vld [vmem:[#allocation8 + $0x290] sm:$0xf]  ;;  %v3136_v21 = vld [vmem:[#allocation8 + $0x5d0] sm:$0xf0] }
  0x58   :  { %1832 = vmatpush.bf16.msra.mxu1 %v3195_v47  ;;  %v2816_v47 = vld [vmem:[#allocation8 + $0x350] sm:$0xf0]  ;;  %v3606_v29 = vld [vmem:[#allocation8 + $0x54c] sm:$0xf0] }
  0x59   :  { %1819 = vmatpush.bf16.msra.mxu0 %v2683_v46  ;;  %1796 = vmatpush.bf16.msrb.mxu2 %v2487_v0  ;;  %v3534_v46 = vld [vmem:[#allocation8 + $0x314] sm:$0xf]  ;;  %v2686_v0 = vld [vmem:[#allocation8 + $0x210] sm:$0xf]  ;;  %v3071_v35 = vor.u32 %v3606_v29, %v3070_v28  ;;  %v3519_v28 = vld [vmem:[#allocation8 + $0x29c] sm:$0xf] }
  0x5a   :  { %v2687_v10 = vor.u32 %v3510_v1, %v2686_v0  ;;  %v3470_v30 = vld [vmem:[#allocation8 + $0x114] sm:$0xf]  ;;  %v2430_v48 = vld [vmem:[#allocation8 + $0x10] sm:$0xf]  ;;  %v3551_v0 = vld [vmem:[#allocation8 + $0x39c] sm:$0xf] }
  0x5b   :  { %1809 = vmatpush.bf16.msrb.mxu3 %v2999_v4  ;;  %v3198_v4 = vld [vmem:[#allocation8 + $0x610] sm:$0xf]  ;;  %v3072_v33 = vld [vmem:[#allocation8 + $0x550] sm:$0xf0]  ;;  %v2760_v29 = vld [vmem:[#allocation8 + $0x2d8] sm:$0xf0] }
  0x5c   :  { %1833 = vmatpush.bf16.msra.mxu1 %v3131_v54  ;;  %v2819_v54 = vor.u32 %v3534_v46, %v2816_v47  ;;  %v3454_v44 = vld [vmem:[#allocation8 + $0x94] sm:$0xf] }
  0x5d   :  { %1820 = vmatpush.bf16.msra.mxu0 %v2619_v53  ;;  %1797 = vmatpush.bf16.msrb.mxu2 %v2423_v12  ;;  %v3526_v53 = vld [vmem:[#allocation8 + $0x2cc] sm:$0xf0]  ;;  %v2496_v45 = vld [vmem:[#allocation8 + $0xd0] sm:$0xf0] }
  0x5e   :  { %v2751_v62 = vor.u32 %v3526_v53, %v2750_v52  ;;  %v2622_v12 = vld [vmem:[#allocation8 + $0x190] sm:$0xf]  ;;  %v3582_v46 = vld [vmem:[#allocation8 + $0x494] sm:$0xf] }
  0x5f   :  { %1810 = vmatpush.bf16.msrb.mxu3 %v2935_v16  ;;  %v3134_v16 = vld [vmem:[#allocation8 + $0x590] sm:$0xf]  ;;  %v3008_v47 = vld [vmem:[#allocation8 + $0x4d0] sm:$0xf0] }
  0x60   :  { %1834 = vmatpush.bf16.msra.mxu1 %v3067_v60  ;;  %v3646_v60 = vld [vmem:[#allocation8 + $0x694] sm:$0xf]  ;;  %v2942_v52 = vld [vmem:[#allocation8 + $0x410] sm:$0xf] }
  0x61   :  { %1821 = vmatpush.bf16.msra.mxu0 %v2555_v59  ;;  %v2752_v59 = vld [vmem:[#allocation8 + $0x2d0] sm:$0xf0]  ;;  %v3267_v3 = vor.u32 %v3646_v60, %v3264_v61  ;;  %v3574_v53 = vld [vmem:[#allocation8 + $0x44c] sm:$0xf0]  ;;  %v2886_v60 = vld [vmem:[#allocation8 + $0x398] sm:$0xf] }
  0x62   :  { %v2755_v2 = vor.u32 %v3518_v58, %v2752_v59  ;;  %v3438_v56 = vld [vmem:[#allocation8 + $0x14] sm:$0xf]  ;;  %v3559_v61 = vld [vmem:[#allocation8 + $0x3d4] sm:$0xf0] }
  0x63   :  { %v2432_v57 = vld [vmem:[#allocation8 + $0x50] sm:$0xf0] }
  0x64   :  { %1835 = vmatpush.bf16.msra.mxu1 %v3003_v8  ;;  %v3630_v8 = vld [vmem:[#allocation8 + $0x614] sm:$0xf]  ;;  %v2435_v6 = vor.u32 %v3438_v56, %v2432_v57  ;;  %v3615_v56 = vld [vmem:[#allocation8 + $0x59c] sm:$0xf] }
  0x65   :  { %1822 = vmatpush.bf16.msra.mxu0 %v2491_v5  ;;  %v3638_v5 = vld [vmem:[#allocation8 + $0x64c] sm:$0xf0]  ;;  %v3203_v15 = vor.u32 %v3630_v8, %v3200_v9  ;;  %v3566_v58 = vld [vmem:[#allocation8 + $0x414] sm:$0xf]  ;;  %v2887_v8 = vor.u32 %v3559_v61, %v2886_v60  ;;  %v3144_v57 = vld [vmem:[#allocation8 + $0x5d8] sm:$0xf0] }
  0x66   :  { %v3199_v11 = vor.u32 %v3638_v5, %v3198_v4  ;;  %v2944_v59 = vld [vmem:[#allocation8 + $0x450] sm:$0xf0]  ;;  %v3679_v4 = vld [vmem:[#allocation8 + $0x79c] sm:$0xf]  ;;  %v2566_v60 = vld [vmem:[#allocation8 + $0x118] sm:$0xf] }
  0x67   :  { %v3400_v5 = vld [vmem:[#allocation8 + $0x7d8] sm:$0xf0]  ;;  %v2947_v7 = vor.u32 %v3566_v58, %v2944_v59  ;;  %v3479_v61 = vld [vmem:[#allocation8 + $0x154] sm:$0xf0] }
  0x68   :  { %1836 = vmatpush.bf16.msra.mxu1 %v2939_v20  ;;  %v3614_v20 = vld [vmem:[#allocation8 + $0x594] sm:$0xf] }
  0x69   :  { %1823 = vmatpush.bf16.msra.mxu0 %v2427_v17  ;;  %v3622_v17 = vld [vmem:[#allocation8 + $0x5cc] sm:$0xf0] }
  0xa8   :  { %v161_v27 = vpop.f32.mrf.mxu1 }
  0xa9   :  { %v141_v26 = vpop.f32.mrf.mxu0  ;;  %v162_v32 = vadd.f32 %v161_v27, %v117_v23  ;;  %v3135_v23 = vor.u32 %v3622_v17, %v3134_v16  ;;  %v3139_v27 = vor.u32 %v3614_v20, %v3136_v21  ;;  %v3535_v16 = vld [vmem:[#allocation8 + $0x31c] sm:$0xf] }
  0xaa   :  { %v142_v31 = vadd.f32 %v141_v26, %v116_v22  ;;  %v2623_v22 = vor.u32 %v3494_v13, %v2622_v12  ;;  %v2627_v26 = vor.u32 %v3486_v18, %v2624_v19  ;;  %v3403_v13 = vor.u32 %v3679_v4, %v3400_v5  ;;  %v2824_v17 = vld [vmem:[#allocation8 + $0x358] sm:$0xf0] }
  0xab   :  { %v3947_v37 = vpack.c.bf16 %v162_v32, %v162_v32  ;;  %v3598_v32 = vld [vmem:[#allocation8 + $0x514] sm:$0xf]  ;;  %v3663_v18 = vld [vmem:[#allocation8 + $0x71c] sm:$0xf]  ;;  %v2827_v24 = vor.u32 %v3535_v16, %v2824_v17 }
  0xac   :  { %v3945_v36 = vpack.c.bf16 %v142_v31, %v142_v31  ;;  %v2560_v31 = vld [vmem:[#allocation8 + $0x150] sm:$0xf0]  ;;  %v3075_v41 = vor.u32 %v3598_v32, %v3072_v33  ;;  %v3336_v19 = vld [vmem:[#allocation8 + $0x758] sm:$0xf0] }
  0xad   :  { %1759 = vmatmul.bf16.vlgmr.msra.gmra.mxu3 %v3947_v37  ;;  %1785 = vmatmul.bf16.vlgmr.msrb.gmra.mxu1 %v3947_v37  ;;  %v2563_v40 = vor.u32 %v3470_v30, %v2560_v31  ;;  %v3339_v25 = vor.u32 %v3663_v18, %v3336_v19  ;;  %v3647_v30 = vld [vmem:[#allocation8 + $0x69c] sm:$0xf]  ;;  %v2438_v18 = vld [vmem:[#allocation8 + $0x18] sm:$0xf] }
  0xae   :  { %1746 = vmatmul.bf16.vlgmr.msra.gmra.mxu2 %v3945_v36  ;;  %1772 = vmatmul.bf16.vlgmr.msrb.gmra.mxu0 %v3945_v36  ;;  %v3272_v31 = vld [vmem:[#allocation8 + $0x6d8] sm:$0xf0] }
  0xaf   :  { %1842 = vmatpush.bf16.msra.mxu2 %v2879_v38  ;;  %1855 = vmatpush.bf16.msra.mxu3 %v3391_v39  ;;  %v2494_v38 = vld [vmem:[#allocation8 + $0x90] sm:$0xf]  ;;  %v3599_v4 = vld [vmem:[#allocation8 + $0x51c] sm:$0xf] }
  0xb0   :  { %1868 = vmatpush.bf16.msrb.mxu0 %v2883_v42  ;;  %1881 = vmatpush.bf16.msrb.mxu1 %v3395_v43  ;;  %v3462_v39 = vld [vmem:[#allocation8 + $0xcc] sm:$0xf0]  ;;  %v3080_v5 = vld [vmem:[#allocation8 + $0x558] sm:$0xf0] }
  0xb1   :  { %v3006_v42 = vld [vmem:[#allocation8 + $0x490] sm:$0xf]  ;;  %v2495_v49 = vor.u32 %v3462_v39, %v2494_v38  ;;  %v2763_v38 = vor.u32 %v3519_v28, %v2760_v29  ;;  %v3275_v39 = vor.u32 %v3647_v30, %v3272_v31  ;;  %v3583_v16 = vld [vmem:[#allocation8 + $0x49c] sm:$0xf]  ;;  %v2894_v30 = vld [vmem:[#allocation8 + $0x3a0] sm:$0xf] }
  0xb2   :  { %v3590_v43 = vld [vmem:[#allocation8 + $0x4cc] sm:$0xf0]  ;;  %v3016_v17 = vld [vmem:[#allocation8 + $0x4d8] sm:$0xf0]  ;;  %v3560_v31 = vld [vmem:[#allocation8 + $0x3dc] sm:$0xf0] }
  0xb3   :  { %1843 = vmatpush.bf16.msra.mxu2 %v2815_v50  ;;  %1856 = vmatpush.bf16.msra.mxu3 %v3327_v51  ;;  %v3007_v50 = vor.u32 %v3590_v43, %v3006_v42  ;;  %v3446_v51 = vld [vmem:[#allocation8 + $0x4c] sm:$0xf0]  ;;  %v3503_v42 = vld [vmem:[#allocation8 + $0x21c] sm:$0xf] }
  0xb4   :  { %1869 = vmatpush.bf16.msrb.mxu0 %v2819_v54  ;;  %1882 = vmatpush.bf16.msrb.mxu1 %v3331_v55  ;;  %v2499_v54 = vor.u32 %v3454_v44, %v2496_v45  ;;  %v3011_v55 = vor.u32 %v3582_v46, %v3008_v47  ;;  %v2431_v1 = vor.u32 %v3446_v51, %v2430_v48  ;;  %v2696_v43 = vld [vmem:[#allocation8 + $0x258] sm:$0xf0]  ;;  %v2630_v48 = vld [vmem:[#allocation8 + $0x198] sm:$0xf] }
  0xb5   :  { %v3631_v44 = vld [vmem:[#allocation8 + $0x61c] sm:$0xf] }
  0xb6   :  { %v3208_v45 = vld [vmem:[#allocation8 + $0x658] sm:$0xf0] }
  0xb7   :  { %1844 = vmatpush.bf16.msra.mxu2 %v2751_v62  ;;  %1857 = vmatpush.bf16.msra.mxu3 %v3263_v63  ;;  %v3398_v62 = vld [vmem:[#allocation8 + $0x798] sm:$0xf]  ;;  %v3211_v51 = vor.u32 %v3631_v44, %v3208_v45  ;;  %v3567_v28 = vld [vmem:[#allocation8 + $0x41c] sm:$0xf]  ;;  %v2895_v44 = vor.u32 %v3560_v31, %v2894_v30  ;;  %v2574_v30 = vld [vmem:[#allocation8 + $0x120] sm:$0xf] }
  0xb8   :  { %1870 = vmatpush.bf16.msrb.mxu0 %v2755_v2  ;;  %1883 = vmatpush.bf16.msrb.mxu1 %v3267_v3  ;;  %v3687_v63 = vld [vmem:[#allocation8 + $0x7d4] sm:$0xf0]  ;;  %v2943_v2 = vor.u32 %v3574_v53, %v2942_v52  ;;  %v2888_v3 = vld [vmem:[#allocation8 + $0x3d8] sm:$0xf0]  ;;  %v3480_v31 = vld [vmem:[#allocation8 + $0x15c] sm:$0xf0] }
  0xb9   :  { %v3399_v9 = vor.u32 %v3687_v63, %v3398_v62  ;;  %v2891_v12 = vor.u32 %v3551_v0, %v2888_v3  ;;  %v3142_v52 = vld [vmem:[#allocation8 + $0x598] sm:$0xf]  ;;  %v3147_v63 = vor.u32 %v3615_v56, %v3144_v57  ;;  %v2568_v3 = vld [vmem:[#allocation8 + $0x158] sm:$0xf0] }
  0xba   :  { %v3623_v53 = vld [vmem:[#allocation8 + $0x5d4] sm:$0xf0]  ;;  %v2952_v29 = vld [vmem:[#allocation8 + $0x458] sm:$0xf0] }
  0xbb   :  { %1845 = vmatpush.bf16.msra.mxu2 %v2687_v10  ;;  %1858 = vmatpush.bf16.msra.mxu3 %v3199_v11  ;;  %v2822_v10 = vld [vmem:[#allocation8 + $0x318] sm:$0xf]  ;;  %v3143_v59 = vor.u32 %v3623_v53, %v3142_v52  ;;  %v3536_v52 = vld [vmem:[#allocation8 + $0x324] sm:$0xf] }
  0xbc   :  { %1871 = vmatpush.bf16.msrb.mxu0 %v2691_v14  ;;  %1884 = vmatpush.bf16.msrb.mxu1 %v3203_v15  ;;  %v3543_v11 = vld [vmem:[#allocation8 + $0x354] sm:$0xf0]  ;;  %v2832_v53 = vld [vmem:[#allocation8 + $0x360] sm:$0xf0] }
  0xbd   :  { %1811 = vmatmul.bf16.vlgmr.msrb.gmra.mxu3 %v3947_v37  ;;  %1837 = vmatmul.bf16.vlgmr.msra.gmra.mxu1 %v3947_v37  ;;  %v3334_v14 = vld [vmem:[#allocation8 + $0x718] sm:$0xf]  ;;  %v2823_v20 = vor.u32 %v3543_v11, %v2822_v10  ;;  %v3083_v11 = vor.u32 %v3599_v4, %v3080_v5 }
  0xbe   :  { %1798 = vmatmul.bf16.vlgmr.msrb.gmra.mxu2 %v3945_v36  ;;  %1824 = vmatmul.bf16.vlgmr.msra.gmra.mxu0 %v3945_v36  ;;  %v3671_v15 = vld [vmem:[#allocation8 + $0x754] sm:$0xf0] }
  0xbf   :  { %1846 = vmatpush.bf16.msra.mxu2 %v2623_v22  ;;  %1859 = vmatpush.bf16.msra.mxu3 %v3135_v23  ;;  %v3335_v21 = vor.u32 %v3671_v15, %v3334_v14  ;;  %v2758_v22 = vld [vmem:[#allocation8 + $0x298] sm:$0xf]  ;;  %v3455_v14 = vld [vmem:[#allocation8 + $0x9c] sm:$0xf] }
  0xc0   :  { %1872 = vmatpush.bf16.msrb.mxu0 %v2627_v26  ;;  %1885 = vmatpush.bf16.msrb.mxu1 %v3139_v27  ;;  %v3527_v23 = vld [vmem:[#allocation8 + $0x2d4] sm:$0xf0]  ;;  %v2504_v15 = vld [vmem:[#allocation8 + $0xd8] sm:$0xf0] }
  0xc1   :  { %v3270_v26 = vld [vmem:[#allocation8 + $0x698] sm:$0xf]  ;;  %v2759_v32 = vor.u32 %v3527_v23, %v2758_v22 }
  0xc2   :  { %v3655_v27 = vld [vmem:[#allocation8 + $0x6d4] sm:$0xf0] }
  0xc3   :  { %1847 = vmatpush.bf16.msra.mxu2 %v2559_v34  ;;  %1860 = vmatpush.bf16.msra.mxu3 %v3071_v35  ;;  %v3271_v33 = vor.u32 %v3655_v27, %v3270_v26  ;;  %v2694_v34 = vld [vmem:[#allocation8 + $0x218] sm:$0xf]  ;;  %v3439_v26 = vld [vmem:[#allocation8 + $0x1c] sm:$0xf] }
  0xc4   :  { %1873 = vmatpush.bf16.msrb.mxu0 %v2563_v40  ;;  %1886 = vmatpush.bf16.msrb.mxu1 %v3075_v41  ;;  %v3511_v35 = vld [vmem:[#allocation8 + $0x254] sm:$0xf0]  ;;  %v2440_v27 = vld [vmem:[#allocation8 + $0x58] sm:$0xf0] }
  0xc5   :  { %v3206_v40 = vld [vmem:[#allocation8 + $0x618] sm:$0xf]  ;;  %v2695_v46 = vor.u32 %v3511_v35, %v2694_v34  ;;  %v3552_v34 = vld [vmem:[#allocation8 + $0x3a4] sm:$0xf] }
  0xc6   :  { %v3639_v41 = vld [vmem:[#allocation8 + $0x654] sm:$0xf0] }
  0xc7   :  { %1848 = vmatpush.bf16.msra.mxu2 %v2495_v49  ;;  %1861 = vmatpush.bf16.msra.mxu3 %v3007_v50  ;;  %v3207_v47 = vor.u32 %v3639_v41, %v3206_v40  ;;  %v3495_v49 = vld [vmem:[#allocation8 + $0x1d4] sm:$0xf0]  ;;  %v2699_v50 = vor.u32 %v3503_v42, %v2696_v43  ;;  %v3680_v40 = vld [vmem:[#allocation8 + $0x7a4] sm:$0xf]  ;;  %v2443_v42 = vor.u32 %v3439_v26, %v2440_v27 }
  0xc8   :  { %1874 = vmatpush.bf16.msrb.mxu0 %v2499_v54  ;;  %1887 = vmatpush.bf16.msrb.mxu1 %v3011_v55  ;;  %v3487_v54 = vld [vmem:[#allocation8 + $0x19c] sm:$0xf]  ;;  %v2631_v58 = vor.u32 %v3495_v49, %v2630_v48  ;;  %v3078_v0 = vld [vmem:[#allocation8 + $0x518] sm:$0xf]  ;;  %v3408_v41 = vld [vmem:[#allocation8 + $0x7e0] sm:$0xf0]  ;;  %v2955_v43 = vor.u32 %v3567_v28, %v2952_v29 }
  0xc9   :  { %v2632_v55 = vld [vmem:[#allocation8 + $0x1d8] sm:$0xf0]  ;;  %v2950_v22 = vld [vmem:[#allocation8 + $0x418] sm:$0xf]  ;;  %v3411_v49 = vor.u32 %v3680_v40, %v3408_v41  ;;  %v3616_v26 = vld [vmem:[#allocation8 + $0x5a4] sm:$0xf] }
  0xca   :  { %v2635_v62 = vor.u32 %v3487_v54, %v2632_v55  ;;  %v3575_v23 = vld [vmem:[#allocation8 + $0x454] sm:$0xf0]  ;;  %v3664_v54 = vld [vmem:[#allocation8 + $0x724] sm:$0xf] }
  0xcb   :  { %1849 = vmatpush.bf16.msra.mxu2 %v2431_v1  ;;  %1862 = vmatpush.bf16.msra.mxu3 %v2943_v2  ;;  %v3607_v1 = vld [vmem:[#allocation8 + $0x554] sm:$0xf0]  ;;  %v3471_v2 = vld [vmem:[#allocation8 + $0x11c] sm:$0xf]  ;;  %v3344_v55 = vld [vmem:[#allocation8 + $0x760] sm:$0xf0] }
  0xcc   :  { %1875 = vmatpush.bf16.msrb.mxu0 %v2435_v6  ;;  %1888 = vmatpush.bf16.msrb.mxu1 %v2947_v7  ;;  %v2567_v6 = vor.u32 %v3479_v61, %v2566_v60  ;;  %v3079_v7 = vor.u32 %v3607_v1, %v3078_v0  ;;  %v2571_v10 = vor.u32 %v3471_v2, %v2568_v3  ;;  %v3520_v0 = vld [vmem:[#allocation8 + $0x2a4] sm:$0xf] }
  0xcd   :  { %v2835_v60 = vor.u32 %v3536_v52, %v2832_v53  ;;  %v3347_v61 = vor.u32 %v3664_v54, %v3344_v55  ;;  %v2768_v1 = vld [vmem:[#allocation8 + $0x2e0] sm:$0xf0]  ;;  %v2446_v54 = vld [vmem:[#allocation8 + $0x20] sm:$0xf] }
  0xce   :  { %1850 = vmatmul.bf16.vlgmr.msra.gmra.mxu2 %v3945_v36  ;;  %1863 = vmatmul.bf16.vlgmr.msra.gmra.mxu3 %v3947_v37  ;;  %v3648_v2 = vld [vmem:[#allocation8 + $0x6a4] sm:$0xf] }
  0xcf   :  { %1894 = vmatpush.bf16.msrb.mxu2 %v2887_v8  ;;  %1907 = vmatpush.bf16.msrb.mxu3 %v3399_v9  ;;  %v2502_v8 = vld [vmem:[#allocation8 + $0x98] sm:$0xf]  ;;  %v3280_v3 = vld [vmem:[#allocation8 + $0x6e0] sm:$0xf0] }
  0xd0   :  { %1920 = vmatpush.bf16.msra.mxu0 %v2891_v12  ;;  %1933 = vmatpush.bf16.msra.mxu1 %v3403_v13  ;;  %v3463_v9 = vld [vmem:[#allocation8 + $0xd4] sm:$0xf0]  ;;  %v3152_v27 = vld [vmem:[#allocation8 + $0x5e0] sm:$0xf0] }
  0xd1   :  { %1876 = vmatmul.bf16.vlgmr.msrb.gmra.mxu0 %v3945_v36  ;;  %1889 = vmatmul.bf16.vlgmr.msrb.gmra.mxu1 %v3947_v37  ;;  %v3014_v12 = vld [vmem:[#allocation8 + $0x498] sm:$0xf]  ;;  %v2503_v19 = vor.u32 %v3463_v9, %v2502_v8  ;;  %v2771_v8 = vor.u32 %v3520_v0, %v2768_v1  ;;  %v3283_v9 = vor.u32 %v3648_v2, %v3280_v3  ;;  %v3600_v40 = vld [vmem:[#allocation8 + $0x524] sm:$0xf]  ;;  %v2902_v2 = vld [vmem:[#allocation8 + $0x3a8] sm:$0xf] }
  0xd2   :  { %v3591_v13 = vld [vmem:[#allocation8 + $0x4d4] sm:$0xf0]  ;;  %v3088_v41 = vld [vmem:[#allocation8 + $0x560] sm:$0xf0]  ;;  %v3561_v3 = vld [vmem:[#allocation8 + $0x3e4] sm:$0xf0] }
  0xd3   :  { %1895 = vmatpush.bf16.msrb.mxu2 %v2823_v20  ;;  %1908 = vmatpush.bf16.msrb.mxu3 %v3335_v21  ;;  %v3015_v20 = vor.u32 %v3591_v13, %v3014_v12  ;;  %v3447_v21 = vld [vmem:[#allocation8 + $0x54] sm:$0xf0]  ;;  %v3504_v12 = vld [vmem:[#allocation8 + $0x224] sm:$0xf] }
  0xd4   :  { %1921 = vmatpush.bf16.msra.mxu0 %v2827_v24  ;;  %1934 = vmatpush.bf16.msra.mxu1 %v3339_v25  ;;  %v2507_v24 = vor.u32 %v3455_v14, %v2504_v15  ;;  %v3019_v25 = vor.u32 %v3583_v16, %v3016_v17  ;;  %v2439_v35 = vor.u32 %v3447_v21, %v2438_v18  ;;  %v2704_v13 = vld [vmem:[#allocation8 + $0x260] sm:$0xf0]  ;;  %v2638_v18 = vld [vmem:[#allocation8 + $0x1a0] sm:$0xf] }
  0xd5   :  { %v3632_v14 = vld [vmem:[#allocation8 + $0x624] sm:$0xf] }
  0xd6   :  { %v3216_v15 = vld [vmem:[#allocation8 + $0x660] sm:$0xf0] }
  0xd7   :  { %1896 = vmatpush.bf16.msrb.mxu2 %v2759_v32  ;;  %1909 = vmatpush.bf16.msrb.mxu3 %v3271_v33  ;;  %v3406_v32 = vld [vmem:[#allocation8 + $0x7a0] sm:$0xf]  ;;  %v3219_v21 = vor.u32 %v3632_v14, %v3216_v15  ;;  %v3584_v52 = vld [vmem:[#allocation8 + $0x4a4] sm:$0xf]  ;;  %v2903_v14 = vor.u32 %v3561_v3, %v2902_v2  ;;  %v2582_v2 = vld [vmem:[#allocation8 + $0x128] sm:$0xf] }
  0xd8   :  { %1922 = vmatpush.bf16.msra.mxu0 %v2763_v38  ;;  %1935 = vmatpush.bf16.msra.mxu1 %v3275_v39  ;;  %v3688_v33 = vld [vmem:[#allocation8 + $0x7dc] sm:$0xf0]  ;;  %v2951_v38 = vor.u32 %v3575_v23, %v2950_v22  ;;  %v2896_v39 = vld [vmem:[#allocation8 + $0x3e0] sm:$0xf0]  ;;  %v3481_v3 = vld [vmem:[#allocation8 + $0x164] sm:$0xf0] }
  0xd9   :  { %v3407_v45 = vor.u32 %v3688_v33, %v3406_v32  ;;  %v2899_v48 = vor.u32 %v3552_v34, %v2896_v39  ;;  %v3150_v22 = vld [vmem:[#allocation8 + $0x5a0] sm:$0xf]  ;;  %v3155_v33 = vor.u32 %v3616_v26, %v3152_v27  ;;  %v2576_v39 = vld [vmem:[#allocation8 + $0x160] sm:$0xf0] }
  0xda   :  { %v3624_v23 = vld [vmem:[#allocation8 + $0x5dc] sm:$0xf0]  ;;  %v3024_v53 = vld [vmem:[#allocation8 + $0x4e0] sm:$0xf0] }
  0xdb   :  { %1897 = vmatpush.bf16.msrb.mxu2 %v2695_v46  ;;  %1910 = vmatpush.bf16.msrb.mxu3 %v3207_v47  ;;  %v2830_v46 = vld [vmem:[#allocation8 + $0x320] sm:$0xf]  ;;  %v3151_v29 = vor.u32 %v3624_v23, %v3150_v22  ;;  %v3568_v0 = vld [vmem:[#allocation8 + $0x424] sm:$0xf]  ;;  %v3537_v22 = vld [vmem:[#allocation8 + $0x32c] sm:$0xf] }
  0xdc   :  { %1923 = vmatpush.bf16.msra.mxu0 %v2699_v50  ;;  %1936 = vmatpush.bf16.msra.mxu1 %v3211_v51  ;;  %v3544_v47 = vld [vmem:[#allocation8 + $0x35c] sm:$0xf0]  ;;  %v2960_v1 = vld [vmem:[#allocation8 + $0x460] sm:$0xf0]  ;;  %v2840_v23 = vld [vmem:[#allocation8 + $0x368] sm:$0xf0] }
  0xdd   :  { %v3342_v50 = vld [vmem:[#allocation8 + $0x720] sm:$0xf]  ;;  %v2831_v56 = vor.u32 %v3544_v47, %v2830_v46  ;;  %v3091_v47 = vor.u32 %v3600_v40, %v3088_v41 }
  0xde   :  { %v3672_v51 = vld [vmem:[#allocation8 + $0x75c] sm:$0xf0] }
  0xdf   :  { %1898 = vmatpush.bf16.msrb.mxu2 %v2631_v58  ;;  %1911 = vmatpush.bf16.msrb.mxu3 %v3143_v59  ;;  %v3343_v57 = vor.u32 %v3672_v51, %v3342_v50  ;;  %v2766_v58 = vld [vmem:[#allocation8 + $0x2a0] sm:$0xf]  ;;  %v3456_v50 = vld [vmem:[#allocation8 + $0xa4] sm:$0xf] }
  0xe0   :  { %1924 = vmatpush.bf16.msra.mxu0 %v2635_v62  ;;  %1937 = vmatpush.bf16.msra.mxu1 %v3147_v63  ;;  %v3528_v59 = vld [vmem:[#allocation8 + $0x2dc] sm:$0xf0]  ;;  %v2512_v51 = vld [vmem:[#allocation8 + $0xe0] sm:$0xf0] }
  0xe1   :  { %v3278_v62 = vld [vmem:[#allocation8 + $0x6a0] sm:$0xf]  ;;  %v2767_v4 = vor.u32 %v3528_v59, %v2766_v58 }
  0xe2   :  { %v3656_v63 = vld [vmem:[#allocation8 + $0x6dc] sm:$0xf0] }
  0xe3   :  { %1899 = vmatpush.bf16.msrb.mxu2 %v2567_v6  ;;  %1912 = vmatpush.bf16.msrb.mxu3 %v3079_v7  ;;  %v3279_v5 = vor.u32 %v3656_v63, %v3278_v62  ;;  %v2702_v6 = vld [vmem:[#allocation8 + $0x220] sm:$0xf]  ;;  %v3440_v62 = vld [vmem:[#allocation8 + $0x24] sm:$0xf] }
  0xe4   :  { %1925 = vmatpush.bf16.msra.mxu0 %v2571_v10  ;;  %1938 = vmatpush.bf16.msra.mxu1 %v3083_v11  ;;  %v3512_v7 = vld [vmem:[#allocation8 + $0x25c] sm:$0xf0]  ;;  %v2448_v63 = vld [vmem:[#allocation8 + $0x60] sm:$0xf0] }
  0xe5   :  { %v3214_v10 = vld [vmem:[#allocation8 + $0x620] sm:$0xf]  ;;  %v2703_v16 = vor.u32 %v3512_v7, %v2702_v6  ;;  %v3553_v6 = vld [vmem:[#allocation8 + $0x3ac] sm:$0xf] }
  0xe6   :  { %v3640_v11 = vld [vmem:[#allocation8 + $0x65c] sm:$0xf0] }
  0xe7   :  { %1900 = vmatpush.bf16.msrb.mxu2 %v2503_v19  ;;  %1913 = vmatpush.bf16.msrb.mxu3 %v3015_v20  ;;  %v3215_v17 = vor.u32 %v3640_v11, %v3214_v10  ;;  %v3496_v19 = vld [vmem:[#allocation8 + $0x1dc] sm:$0xf0]  ;;  %v2707_v20 = vor.u32 %v3504_v12, %v2704_v13  ;;  %v3681_v10 = vld [vmem:[#allocation8 + $0x7ac] sm:$0xf]  ;;  %v2451_v12 = vor.u32 %v3440_v62, %v2448_v63 }
  0xe8   :  { %1926 = vmatpush.bf16.msra.mxu0 %v2507_v24  ;;  %1939 = vmatpush.bf16.msra.mxu1 %v3019_v25  ;;  %v3488_v24 = vld [vmem:[#allocation8 + $0x1a4] sm:$0xf]  ;;  %v2639_v28 = vor.u32 %v3496_v19, %v2638_v18  ;;  %v3086_v34 = vld [vmem:[#allocation8 + $0x520] sm:$0xf]  ;;  %v3416_v11 = vld [vmem:[#allocation8 + $0x7e8] sm:$0xf0]  ;;  %v2963_v13 = vor.u32 %v3568_v0, %v2960_v1 }
  0xe9   :  { %v2640_v25 = vld [vmem:[#allocation8 + $0x1e0] sm:$0xf0]  ;;  %v2958_v58 = vld [vmem:[#allocation8 + $0x420] sm:$0xf]  ;;  %v3419_v19 = vor.u32 %v3681_v10, %v3416_v11  ;;  %v3617_v62 = vld [vmem:[#allocation8 + $0x5ac] sm:$0xf] }
  0xea   :  { %v2643_v32 = vor.u32 %v3488_v24, %v2640_v25  ;;  %v3576_v59 = vld [vmem:[#allocation8 + $0x45c] sm:$0xf0]  ;;  %v3665_v24 = vld [vmem:[#allocation8 + $0x72c] sm:$0xf] }
  0xeb   :  { %1901 = vmatpush.bf16.msrb.mxu2 %v2439_v35  ;;  %1914 = vmatpush.bf16.msrb.mxu3 %v2951_v38  ;;  %v3608_v35 = vld [vmem:[#allocation8 + $0x55c] sm:$0xf0]  ;;  %v3472_v38 = vld [vmem:[#allocation8 + $0x124] sm:$0xf]  ;;  %v3352_v25 = vld [vmem:[#allocation8 + $0x768] sm:$0xf0] }
  0xec   :  { %1927 = vmatpush.bf16.msra.mxu0 %v2443_v42  ;;  %1940 = vmatpush.bf16.msra.mxu1 %v2955_v43  ;;  %v2575_v42 = vor.u32 %v3480_v31, %v2574_v30  ;;  %v3087_v43 = vor.u32 %v3608_v35, %v3086_v34  ;;  %v2579_v46 = vor.u32 %v3472_v38, %v2576_v39  ;;  %v3521_v34 = vld [vmem:[#allocation8 + $0x2ac] sm:$0xf] }
  0xed   :  { %v2843_v30 = vor.u32 %v3537_v22, %v2840_v23  ;;  %v3355_v31 = vor.u32 %v3665_v24, %v3352_v25  ;;  %v2776_v35 = vld [vmem:[#allocation8 + $0x2e8] sm:$0xf0]  ;;  %v2454_v24 = vld [vmem:[#allocation8 + $0x28] sm:$0xf] }
  0xee   :  { %1902 = vmatmul.bf16.vlgmr.msrb.gmra.mxu2 %v3945_v36  ;;  %1915 = vmatmul.bf16.vlgmr.msrb.gmra.mxu3 %v3947_v37  ;;  %v3649_v38 = vld [vmem:[#allocation8 + $0x6ac] sm:$0xf] }
  0xef   :  { %1946 = vmatpush.bf16.msra.mxu2 %v2895_v44  ;;  %1959 = vmatpush.bf16.msra.mxu3 %v3407_v45  ;;  %v2510_v44 = vld [vmem:[#allocation8 + $0xa0] sm:$0xf]  ;;  %v3288_v39 = vld [vmem:[#allocation8 + $0x6e8] sm:$0xf0] }
  0xf0   :  { %1972 = vmatpush.bf16.msrb.mxu0 %v2899_v48  ;;  %1985 = vmatpush.bf16.msrb.mxu1 %v3411_v49  ;;  %v3464_v45 = vld [vmem:[#allocation8 + $0xdc] sm:$0xf0]  ;;  %v3160_v63 = vld [vmem:[#allocation8 + $0x5e8] sm:$0xf0] }
  0xf1   :  { %1928 = vmatmul.bf16.vlgmr.msra.gmra.mxu0 %v3945_v36  ;;  %1941 = vmatmul.bf16.vlgmr.msra.gmra.mxu1 %v3947_v37  ;;  %v3022_v48 = vld [vmem:[#allocation8 + $0x4a0] sm:$0xf]  ;;  %v2511_v55 = vor.u32 %v3464_v45, %v2510_v44  ;;  %v2779_v44 = vor.u32 %v3521_v34, %v2776_v35  ;;  %v3291_v45 = vor.u32 %v3649_v38, %v3288_v39  ;;  %v3601_v10 = vld [vmem:[#allocation8 + $0x52c] sm:$0xf]  ;;  %v2910_v38 = vld [vmem:[#allocation8 + $0x3b0] sm:$0xf] }
  0xf2   :  { %v3592_v49 = vld [vmem:[#allocation8 + $0x4dc] sm:$0xf0]  ;;  %v3096_v11 = vld [vmem:[#allocation8 + $0x568] sm:$0xf0]  ;;  %v3562_v39 = vld [vmem:[#allocation8 + $0x3ec] sm:$0xf0] }
  0xf3   :  { %1947 = vmatpush.bf16.msra.mxu2 %v2831_v56  ;;  %1960 = vmatpush.bf16.msra.mxu3 %v3343_v57  ;;  %v3023_v56 = vor.u32 %v3592_v49, %v3022_v48  ;;  %v3448_v57 = vld [vmem:[#allocation8 + $0x5c] sm:$0xf0]  ;;  %v3505_v48 = vld [vmem:[#allocation8 + $0x22c] sm:$0xf] }
  0xf4   :  { %1973 = vmatpush.bf16.msrb.mxu0 %v2835_v60  ;;  %1986 = vmatpush.bf16.msrb.mxu1 %v3347_v61  ;;  %v2515_v60 = vor.u32 %v3456_v50, %v2512_v51  ;;  %v3027_v61 = vor.u32 %v3584_v52, %v3024_v53  ;;  %v2447_v7 = vor.u32 %v3448_v57, %v2446_v54  ;;  %v2712_v49 = vld [vmem:[#allocation8 + $0x268] sm:$0xf0]  ;;  %v2646_v54 = vld [vmem:[#allocation8 + $0x1a8] sm:$0xf] }
  0xf5   :  { %v3633_v50 = vld [vmem:[#allocation8 + $0x62c] sm:$0xf] }
  0xf6   :  { %v3224_v51 = vld [vmem:[#allocation8 + $0x668] sm:$0xf0] }
  0xf7   :  { %1948 = vmatpush.bf16.msra.mxu2 %v2767_v4  ;;  %1961 = vmatpush.bf16.msra.mxu3 %v3279_v5  ;;  %v3414_v4 = vld [vmem:[#allocation8 + $0x7a8] sm:$0xf]  ;;  %v3227_v57 = vor.u32 %v3633_v50, %v3224_v51  ;;  %v3585_v22 = vld [vmem:[#allocation8 + $0x4ac] sm:$0xf]  ;;  %v2911_v50 = vor.u32 %v3562_v39, %v2910_v38  ;;  %v3166_v39 = vld [vmem:[#allocation8 + $0x5b0] sm:$0xf] }
  0xf8   :  { %1974 = vmatpush.bf16.msrb.mxu0 %v2771_v8  ;;  %1987 = vmatpush.bf16.msrb.mxu1 %v3283_v9  ;;  %v3689_v5 = vld [vmem:[#allocation8 + $0x7e4] sm:$0xf0]  ;;  %v2959_v8 = vor.u32 %v3576_v59, %v2958_v58  ;;  %v2904_v9 = vld [vmem:[#allocation8 + $0x3e8] sm:$0xf0] }
  0xf9   :  { %v3415_v15 = vor.u32 %v3689_v5, %v3414_v4  ;;  %v2907_v18 = vor.u32 %v3553_v6, %v2904_v9  ;;  %v3158_v58 = vld [vmem:[#allocation8 + $0x5a8] sm:$0xf]  ;;  %v3163_v5 = vor.u32 %v3617_v62, %v3160_v63  ;;  %v2584_v9 = vld [vmem:[#allocation8 + $0x168] sm:$0xf0]  ;;  %v3969_v62 = vld [vmem:[#allocation10] sm:$0xff] }
  0xfa   :  { %v3625_v59 = vld [vmem:[#allocation8 + $0x5e4] sm:$0xf0]  ;;  %v3032_v23 = vld [vmem:[#allocation8 + $0x4e8] sm:$0xf0] }
  0xfb   :  { %1949 = vmatpush.bf16.msra.mxu2 %v2703_v16  ;;  %1962 = vmatpush.bf16.msra.mxu3 %v3215_v17  ;;  %v2838_v16 = vld [vmem:[#allocation8 + $0x328] sm:$0xf]  ;;  %v3159_v1 = vor.u32 %v3625_v59, %v3158_v58  ;;  %v3569_v34 = vld [vmem:[#allocation8 + $0x42c] sm:$0xf]  ;;  %v3538_v58 = vld [vmem:[#allocation8 + $0x334] sm:$0xf] }
  0xfc   :  { %1975 = vmatpush.bf16.msrb.mxu0 %v2707_v20  ;;  %1988 = vmatpush.bf16.msrb.mxu1 %v3219_v21  ;;  %v3545_v17 = vld [vmem:[#allocation8 + $0x364] sm:$0xf0]  ;;  %v2968_v35 = vld [vmem:[#allocation8 + $0x468] sm:$0xf0]  ;;  %v2848_v59 = vld [vmem:[#allocation8 + $0x370] sm:$0xf0] }
  0xfd   :  { %v3350_v20 = vld [vmem:[#allocation8 + $0x728] sm:$0xf]  ;;  %v2839_v26 = vor.u32 %v3545_v17, %v2838_v16  ;;  %v3099_v17 = vor.u32 %v3601_v10, %v3096_v11  ;;  %v3650_v10 = vld [vmem:[#allocation8 + $0x6b4] sm:$0xf] }
  0xfe   :  { %v3673_v21 = vld [vmem:[#allocation8 + $0x764] sm:$0xf0]  ;;  %v3296_v11 = vld [vmem:[#allocation8 + $0x6f0] sm:$0xf0] }
  0xff   :  { %1950 = vmatpush.bf16.msra.mxu2 %v2639_v28  ;;  %1963 = vmatpush.bf16.msra.mxu3 %v3151_v29  ;;  %v3351_v27 = vor.u32 %v3673_v21, %v3350_v20  ;;  %v2774_v28 = vld [vmem:[#allocation8 + $0x2a8] sm:$0xf]  ;;  %v3457_v20 = vld [vmem:[#allocation8 + $0xac] sm:$0xf] }
 0x100   :  { %1976 = vmatpush.bf16.msrb.mxu0 %v2643_v32  ;;  %1989 = vmatpush.bf16.msrb.mxu1 %v3155_v33  ;;  %v3529_v29 = vld [vmem:[#allocation8 + $0x2e4] sm:$0xf0]  ;;  %v2520_v21 = vld [vmem:[#allocation8 + $0xe8] sm:$0xf0] }
 0x101   :  { %v3286_v32 = vld [vmem:[#allocation8 + $0x6a8] sm:$0xf]  ;;  %v2775_v40 = vor.u32 %v3529_v29, %v2774_v28 }
 0x102   :  { %v3657_v33 = vld [vmem:[#allocation8 + $0x6e4] sm:$0xf0] }
 0x103   :  { %1951 = vmatpush.bf16.msra.mxu2 %v2575_v42  ;;  %1964 = vmatpush.bf16.msra.mxu3 %v3087_v43  ;;  %v3287_v41 = vor.u32 %v3657_v33, %v3286_v32  ;;  %v2710_v42 = vld [vmem:[#allocation8 + $0x228] sm:$0xf]  ;;  %v3441_v32 = vld [vmem:[#allocation8 + $0x2c] sm:$0xf] }
 0x104   :  { %1977 = vmatpush.bf16.msrb.mxu0 %v2579_v46  ;;  %1990 = vmatpush.bf16.msrb.mxu1 %v3091_v47  ;;  %v3513_v43 = vld [vmem:[#allocation8 + $0x264] sm:$0xf0]  ;;  %v2456_v33 = vld [vmem:[#allocation8 + $0x68] sm:$0xf0] }
 0x105   :  { %v3222_v46 = vld [vmem:[#allocation8 + $0x628] sm:$0xf]  ;;  %v2711_v52 = vor.u32 %v3513_v43, %v2710_v42  ;;  %v3554_v42 = vld [vmem:[#allocation8 + $0x3b4] sm:$0xf] }
 0x106   :  { %v3641_v47 = vld [vmem:[#allocation8 + $0x664] sm:$0xf0] }
 0x107   :  { %1952 = vmatpush.bf16.msra.mxu2 %v2511_v55  ;;  %1965 = vmatpush.bf16.msra.mxu3 %v3023_v56  ;;  %v3223_v53 = vor.u32 %v3641_v47, %v3222_v46  ;;  %v3497_v55 = vld [vmem:[#allocation8 + $0x1e4] sm:$0xf0]  ;;  %v2715_v56 = vor.u32 %v3505_v48, %v2712_v49  ;;  %v3682_v46 = vld [vmem:[#allocation8 + $0x7b4] sm:$0xf]  ;;  %v2459_v48 = vor.u32 %v3441_v32, %v2456_v33  ;;  %v3498_v32 = vld [vmem:[#allocation8 + $0x1ec] sm:$0xf0] }
 0x108   :  { %1978 = vmatpush.bf16.msrb.mxu0 %v2515_v60  ;;  %1991 = vmatpush.bf16.msrb.mxu1 %v3027_v61  ;;  %v3489_v60 = vld [vmem:[#allocation8 + $0x1ac] sm:$0xf]  ;;  %v2647_v0 = vor.u32 %v3497_v55, %v2646_v54  ;;  %v3094_v6 = vld [vmem:[#allocation8 + $0x528] sm:$0xf]  ;;  %v3424_v47 = vld [vmem:[#allocation8 + $0x7f0] sm:$0xf0]  ;;  %v2971_v49 = vor.u32 %v3569_v34, %v2968_v35 }
 0x109   :  { %v2648_v61 = vld [vmem:[#allocation8 + $0x1e8] sm:$0xf0]  ;;  %v2966_v28 = vld [vmem:[#allocation8 + $0x428] sm:$0xf]  ;;  %v3358_v54 = vld [vmem:[#allocation8 + $0x730] sm:$0xf] }
 0x10a   :  { %v2651_v4 = vor.u32 %v3489_v60, %v2648_v61  ;;  %v3577_v29 = vld [vmem:[#allocation8 + $0x464] sm:$0xf0]  ;;  %v3666_v60 = vld [vmem:[#allocation8 + $0x734] sm:$0xf] }
 0x10b   :  { %1953 = vmatpush.bf16.msra.mxu2 %v2447_v7  ;;  %1966 = vmatpush.bf16.msra.mxu3 %v2959_v8  ;;  %v3609_v7 = vld [vmem:[#allocation8 + $0x564] sm:$0xf0]  ;;  %v3473_v8 = vld [vmem:[#allocation8 + $0x12c] sm:$0xf]  ;;  %v3360_v61 = vld [vmem:[#allocation8 + $0x770] sm:$0xf0] }
 0x10c   :  { %1979 = vmatpush.bf16.msrb.mxu0 %v2451_v12  ;;  %1992 = vmatpush.bf16.msrb.mxu1 %v2963_v13  ;;  %v2583_v12 = vor.u32 %v3481_v3, %v2582_v2  ;;  %v3095_v13 = vor.u32 %v3609_v7, %v3094_v6  ;;  %v2587_v16 = vor.u32 %v3473_v8, %v2584_v9  ;;  %v3530_v2 = vld [vmem:[#allocation8 + $0x2ec] sm:$0xf0]  ;;  %v3522_v7 = vld [vmem:[#allocation8 + $0x2b4] sm:$0xf]  ;;  %v1707_v8 = vperm.slane %v3969_v62, 1 }
 0x10d   :  { %v3294_v3 = vld [vmem:[#allocation8 + $0x6b0] sm:$0xf]  ;;  %v2784_v9 = vld [vmem:[#allocation8 + $0x2f0] sm:$0xf0] }
 0x10e   :  { %1954 = vmatmul.bf16.vlgmr.msra.gmra.mxu2 %v3945_v36  ;;  %1967 = vmatmul.bf16.vlgmr.msra.gmra.mxu3 %v3947_v37  ;;  %v3658_v6 = vld [vmem:[#allocation8 + $0x6ec] sm:$0xf0] }
 0x10f   :  { %1998 = vmatpush.bf16.msrb.mxu2 %v2903_v14  ;;  %2011 = vmatpush.bf16.msrb.mxu3 %v3415_v15  ;;  %v2518_v14 = vld [vmem:[#allocation8 + $0xa8] sm:$0xf] }
 0x110   :  { %2024 = vmatpush.bf16.msra.mxu0 %v2907_v18  ;;  %2037 = vmatpush.bf16.msra.mxu1 %v3419_v19  ;;  %v3465_v15 = vld [vmem:[#allocation8 + $0xe4] sm:$0xf0] }
 0x111   :  { %1980 = vmatmul.bf16.vlgmr.msrb.gmra.mxu0 %v3945_v36  ;;  %1993 = vmatmul.bf16.vlgmr.msrb.gmra.mxu1 %v3947_v37  ;;  %v3030_v18 = vld [vmem:[#allocation8 + $0x4a8] sm:$0xf]  ;;  %v2519_v25 = vor.u32 %v3465_v15, %v2518_v14 }
 0x112   :  { %v3593_v19 = vld [vmem:[#allocation8 + $0x4e4] sm:$0xf0] }
 0x113   :  { %1999 = vmatpush.bf16.msrb.mxu2 %v2839_v26  ;;  %2012 = vmatpush.bf16.msrb.mxu3 %v3351_v27  ;;  %v3031_v26 = vor.u32 %v3593_v19, %v3030_v18  ;;  %v3449_v27 = vld [vmem:[#allocation8 + $0x64] sm:$0xf0]  ;;  %v3230_v18 = vld [vmem:[#allocation8 + $0x630] sm:$0xf]  ;;  %v2787_v19 = vor.u32 %v3522_v7, %v2784_v9  ;;  %v1709_v9 = vperm.slane %v3969_v62, 3 }
 0x114   :  { %2025 = vmatpush.bf16.msra.mxu0 %v2843_v30  ;;  %2038 = vmatpush.bf16.msra.mxu1 %v3355_v31  ;;  %v2523_v30 = vor.u32 %v3457_v20, %v2520_v21  ;;  %v3035_v31 = vor.u32 %v3585_v22, %v3032_v23  ;;  %v2455_v43 = vor.u32 %v3449_v27, %v2454_v24  ;;  %v3642_v22 = vld [vmem:[#allocation8 + $0x66c] sm:$0xf0]  ;;  %v3506_v23 = vld [vmem:[#allocation8 + $0x234] sm:$0xf]  ;;  %v1706_v27 = vperm.slane %v3969_v62, 0 }
 0x115   :  { %v3299_v20 = vor.u32 %v3650_v10, %v3296_v11  ;;  %v2720_v24 = vld [vmem:[#allocation8 + $0x270] sm:$0xf0]  ;;  %v3594_v7 = vld [vmem:[#allocation8 + $0x4ec] sm:$0xf0] }
 0x116   :  { %v2723_v33 = vor.u32 %v3506_v23, %v2720_v24  ;;  %v2528_v10 = vld [vmem:[#allocation8 + $0xf0] sm:$0xf0] }
 0x117   :  { %2000 = vmatpush.bf16.msrb.mxu2 %v2775_v40  ;;  %2013 = vmatpush.bf16.msrb.mxu3 %v3287_v41  ;;  %v3422_v40 = vld [vmem:[#allocation8 + $0x7b0] sm:$0xf]  ;;  %v3586_v11 = vld [vmem:[#allocation8 + $0x4b4] sm:$0xf] }
 0x118   :  { %2026 = vmatpush.bf16.msra.mxu0 %v2779_v44  ;;  %2039 = vmatpush.bf16.msra.mxu1 %v3291_v45  ;;  %v3690_v41 = vld [vmem:[#allocation8 + $0x7ec] sm:$0xf0]  ;;  %v2967_v44 = vor.u32 %v3577_v29, %v2966_v28  ;;  %v2912_v45 = vld [vmem:[#allocation8 + $0x3f0] sm:$0xf0] }
 0x119   :  { %v3423_v51 = vor.u32 %v3690_v41, %v3422_v40  ;;  %v2915_v55 = vor.u32 %v3554_v42, %v2912_v45  ;;  %v3626_v40 = vld [vmem:[#allocation8 + $0x5ec] sm:$0xf0]  ;;  %v3490_v41 = vld [vmem:[#allocation8 + $0x1b4] sm:$0xf] }
 0x11a   :  { %v3168_v45 = vld [vmem:[#allocation8 + $0x5f0] sm:$0xf0] }
 0x11b   :  { %2001 = vmatpush.bf16.msrb.mxu2 %v2711_v52  ;;  %2014 = vmatpush.bf16.msrb.mxu3 %v3223_v53  ;;  %v2846_v52 = vld [vmem:[#allocation8 + $0x330] sm:$0xf] }
 0x11c   :  { %2027 = vmatpush.bf16.msra.mxu0 %v2715_v56  ;;  %2040 = vmatpush.bf16.msra.mxu1 %v3227_v57  ;;  %v3546_v53 = vld [vmem:[#allocation8 + $0x36c] sm:$0xf0]  ;;  %v3427_v56 = vor.u32 %v3682_v46, %v3424_v47 }
 0x11d   :  { %v3674_v57 = vld [vmem:[#allocation8 + $0x76c] sm:$0xf0]  ;;  %v2847_v63 = vor.u32 %v3546_v53, %v2846_v52 }
 0x11e   :  { %v3482_v52 = vld [vmem:[#allocation8 + $0x16c] sm:$0xf0] }
 0x11f   :  { %2002 = vmatpush.bf16.msrb.mxu2 %v2647_v0  ;;  %2015 = vmatpush.bf16.msrb.mxu3 %v3159_v1  ;;  %v3359_v0 = vor.u32 %v3674_v57, %v3358_v54  ;;  %v2782_v1 = vld [vmem:[#allocation8 + $0x2b0] sm:$0xf]  ;;  %v3474_v57 = vld [vmem:[#allocation8 + $0x134] sm:$0xf] }
 0x120   :  { %2028 = vmatpush.bf16.msra.mxu0 %v2651_v4  ;;  %2041 = vmatpush.bf16.msra.mxu1 %v3163_v5  ;;  %v2851_v4 = vor.u32 %v3538_v58, %v2848_v59  ;;  %v3363_v5 = vor.u32 %v3666_v60, %v3360_v61  ;;  %v2592_v58 = vld [vmem:[#allocation8 + $0x170] sm:$0xf0] }
 0x121   :  { %v3602_v59 = vld [vmem:[#allocation8 + $0x534] sm:$0xf] }
 0x122   :  { %v3104_v60 = vld [vmem:[#allocation8 + $0x570] sm:$0xf0] }
 0x123   :  { %2003 = vmatpush.bf16.msrb.mxu2 %v2583_v12  ;;  %2016 = vmatpush.bf16.msrb.mxu3 %v3095_v13  ;;  %v2783_v12 = vor.u32 %v3530_v2, %v2782_v1  ;;  %v3295_v13 = vor.u32 %v3658_v6, %v3294_v3  ;;  %v3466_v1 = vld [vmem:[#allocation8 + $0xec] sm:$0xf0]  ;;  %v2595_v3 = vor.u32 %v3474_v57, %v2592_v58  ;;  %v3539_v57 = vld [vmem:[#allocation8 + $0x33c] sm:$0xf] }
 0x124   :  { %2029 = vmatpush.bf16.msra.mxu0 %v2587_v16  ;;  %2042 = vmatpush.bf16.msra.mxu1 %v3099_v17  ;;  %v2718_v16 = vld [vmem:[#allocation8 + $0x230] sm:$0xf] }
 0x125   :  { %v3514_v17 = vld [vmem:[#allocation8 + $0x26c] sm:$0xf0] }
 0x126   :  { %v2719_v29 = vor.u32 %v3514_v17, %v2718_v16  ;;  %v3038_v2 = vld [vmem:[#allocation8 + $0x4b0] sm:$0xf] }
 0x127   :  { %2004 = vmatpush.bf16.msrb.mxu2 %v2519_v25  ;;  %2017 = vmatpush.bf16.msrb.mxu3 %v3031_v26  ;;  %v3634_v25 = vld [vmem:[#allocation8 + $0x634] sm:$0xf]  ;;  %v3039_v16 = vor.u32 %v3594_v7, %v3038_v2  ;;  %v3302_v7 = vld [vmem:[#allocation8 + $0x6b8] sm:$0xf] }
 0x128   :  { %2030 = vmatpush.bf16.msra.mxu0 %v2523_v30  ;;  %2043 = vmatpush.bf16.msra.mxu1 %v3035_v31  ;;  %v3232_v26 = vld [vmem:[#allocation8 + $0x670] sm:$0xf0]  ;;  %v3231_v30 = vor.u32 %v3642_v22, %v3230_v18  ;;  %v2654_v31 = vld [vmem:[#allocation8 + $0x1b0] sm:$0xf] }
 0x129   :  { %v3235_v34 = vor.u32 %v3634_v25, %v3232_v26  ;;  %v2655_v47 = vor.u32 %v3498_v32, %v2654_v31  ;;  %v2464_v25 = vld [vmem:[#allocation8 + $0x70] sm:$0xf0]  ;;  %v1708_v31 = vperm.slane %v3969_v62, 2 }
 0x12a   :  { %v1786_v15 = vpop.f32.mrf.mxu1  ;;  %v3570_v26 = vld [vmem:[#allocation8 + $0x434] sm:$0xf] }
 0x12b   :  { %2005 = vmatpush.bf16.msrb.mxu2 %v2455_v43  ;;  %2018 = vmatpush.bf16.msrb.mxu3 %v2967_v44  ;;  %v1773_v14 = vpop.f32.mrf.mxu0  ;;  %v2656_v43 = vld [vmem:[#allocation8 + $0x1f0] sm:$0xf0] }
 0x12c   :  { %2031 = vmatpush.bf16.msra.mxu0 %v2459_v48  ;;  %2044 = vmatpush.bf16.msra.mxu1 %v2971_v49  ;;  %v1774_v21 = vadd.f32 %v1773_v14, %v1707_v8  ;;  %v3618_v44 = vld [vmem:[#allocation8 + $0x5b4] sm:$0xf]  ;;  %v3167_v48 = vor.u32 %v3626_v40, %v3166_v39  ;;  %v2659_v53 = vor.u32 %v3490_v41, %v2656_v43  ;;  %v3450_v14 = vld [vmem:[#allocation8 + $0x6c] sm:$0xf0]  ;;  %v2920_v40 = vld [vmem:[#allocation8 + $0x3f8] sm:$0xf0] }
 0x12d   :  { %v3171_v54 = vor.u32 %v3618_v44, %v3168_v45  ;;  %v3458_v8 = vld [vmem:[#allocation8 + $0xb4] sm:$0xf]  ;;  %v3683_v41 = vld [vmem:[#allocation8 + $0x7bc] sm:$0xf] }
 0x12e   :  { %2006 = vmatmul.bf16.vlgmr.msrb.gmra.mxu2 %v3945_v36  ;;  %2019 = vmatmul.bf16.vlgmr.msrb.gmra.mxu3 %v3947_v37  ;;  %v3977_v28 = vadd.f32 %v1786_v15, %v1774_v21  ;;  %v3442_v21 = vld [vmem:[#allocation8 + $0x34] sm:$0xf]  ;;  %v2531_v22 = vor.u32 %v3458_v8, %v2528_v10  ;;  %v3659_v8 = vld [vmem:[#allocation8 + $0x6f4] sm:$0xf0]  ;;  %v2792_v10 = vld [vmem:[#allocation8 + $0x2f8] sm:$0xf0] }
 0x12f   :  { %2050 = vmatpush.bf16.msra.mxu2 %v2911_v50  ;;  %2063 = vmatpush.bf16.msra.mxu3 %v3423_v51  ;;  %v2590_v51 = vld [vmem:[#allocation8 + $0x130] sm:$0xf]  ;;  %v2467_v43 = vor.u32 %v3442_v21, %v2464_v25  ;;  %v2728_v25 = vld [vmem:[#allocation8 + $0x278] sm:$0xf0] }
 0x130   :  { %2076 = vmatpush.bf16.msrb.mxu0 %v2915_v55  ;;  %2089 = vmatpush.bf16.msrb.mxu1 %v3427_v56  ;;  %v1760_v38 = vpop.f32.mrf.mxu3  ;;  %v3102_v55 = vld [vmem:[#allocation8 + $0x530] sm:$0xf]  ;;  %v2591_v61 = vor.u32 %v3482_v52, %v2590_v51  ;;  %v2854_v51 = vld [vmem:[#allocation8 + $0x338] sm:$0xf] }
 0x131   :  { %2032 = vmatmul.bf16.vlgmr.msra.gmra.mxu0 %v3945_v36  ;;  %2045 = vmatmul.bf16.vlgmr.msra.gmra.mxu1 %v3947_v37  ;;  %v1747_v35 = vpop.f32.mrf.mxu2  ;;  %v3610_v56 = vld [vmem:[#allocation8 + $0x56c] sm:$0xf0]  ;;  %v3547_v52 = vld [vmem:[#allocation8 + $0x374] sm:$0xf0] }
 0x132   :  { %v1748_v42 = vadd.f32 %v1747_v35, %v1706_v27  ;;  %v1788_v50 = vpop.f32.mrf.mxu1  ;;  %v2976_v27 = vld [vmem:[#allocation8 + $0x470] sm:$0xf0]  ;;  %v3555_v35 = vld [vmem:[#allocation8 + $0x3bc] sm:$0xf] }
 0x133   :  { %2051 = vmatpush.bf16.msra.mxu2 %v2847_v63  ;;  %2064 = vmatpush.bf16.msra.mxu3 %v3359_v0  ;;  %v1775_v49 = vpop.f32.mrf.mxu0  ;;  %v3103_v63 = vor.u32 %v3610_v56, %v3102_v55  ;;  %v2526_v0 = vld [vmem:[#allocation8 + $0xb0] sm:$0xf]  ;;  %v2979_v44 = vor.u32 %v3570_v26, %v2976_v27  ;;  %v3366_v55 = vld [vmem:[#allocation8 + $0x738] sm:$0xf]  ;;  %v3635_v26 = vld [vmem:[#allocation8 + $0x63c] sm:$0xf] }
 0x134   :  { %2077 = vmatpush.bf16.msrb.mxu0 %v2851_v4  ;;  %2090 = vmatpush.bf16.msrb.mxu1 %v3363_v5  ;;  %v3979_v46 = vadd.f32 %v1760_v38, %v1748_v42  ;;  %v3107_v4 = vor.u32 %v3602_v59, %v3104_v60  ;;  %v2527_v15 = vor.u32 %v3466_v1, %v2526_v0  ;;  %v3432_v42 = vld [vmem:[#allocation8 + $0x7f8] sm:$0xf0]  ;;  %v3675_v56 = vld [vmem:[#allocation8 + $0x774] sm:$0xf0] }
 0x135   :  { %v3368_v0 = vld [vmem:[#allocation8 + $0x778] sm:$0xf0]  ;;  %v2855_v1 = vor.u32 %v3547_v52, %v2854_v51  ;;  %v3367_v2 = vor.u32 %v3675_v56, %v3366_v55  ;;  %v2598_v52 = vld [vmem:[#allocation8 + $0x138] sm:$0xf] }
 0x136   :  { %v3240_v27 = vld [vmem:[#allocation8 + $0x678] sm:$0xf0] }
 0x137   :  { %2052 = vmatpush.bf16.msra.mxu2 %v2783_v12  ;;  %2065 = vmatpush.bf16.msra.mxu3 %v3295_v13  ;;  %v3040_v12 = vld [vmem:[#allocation8 + $0x4f0] sm:$0xf0]  ;;  %v2462_v13 = vld [vmem:[#allocation8 + $0x30] sm:$0xf] }
 0x138   :  { %2078 = vmatpush.bf16.msrb.mxu0 %v2787_v19  ;;  %2091 = vmatpush.bf16.msrb.mxu1 %v3299_v20  ;;  %v1762_v6 = vpop.f32.mrf.mxu3  ;;  %v2974_v19 = vld [vmem:[#allocation8 + $0x430] sm:$0xf]  ;;  %v3043_v23 = vor.u32 %v3586_v11, %v3040_v12  ;;  %v2463_v38 = vor.u32 %v3450_v14, %v2462_v13  ;;  %v3651_v11 = vld [vmem:[#allocation8 + $0x6bc] sm:$0xf] }
 0x139   :  { %v1749_v5 = vpop.f32.mrf.mxu2  ;;  %v3578_v20 = vld [vmem:[#allocation8 + $0x46c] sm:$0xf0]  ;;  %v3304_v12 = vld [vmem:[#allocation8 + $0x6f8] sm:$0xf0] }
 0x13a   :  { %v1838_v18 = vpop.f32.mrf.mxu1  ;;  %v2975_v39 = vor.u32 %v3578_v20, %v2974_v19  ;;  %v3515_v19 = vld [vmem:[#allocation8 + $0x274] sm:$0xf0]  ;;  %v3307_v21 = vor.u32 %v3651_v11, %v3304_v12 }
 0x13b   :  { %2053 = vmatpush.bf16.msra.mxu2 %v2719_v29  ;;  %2066 = vmatpush.bf16.msra.mxu3 %v3231_v30  ;;  %v1825_v17 = vpop.f32.mrf.mxu0  ;;  %v2918_v29 = vld [vmem:[#allocation8 + $0x3b8] sm:$0xf] }
 0x13c   :  { %2079 = vmatpush.bf16.msrb.mxu0 %v2723_v33  ;;  %2092 = vmatpush.bf16.msrb.mxu1 %v3235_v34  ;;  %v1826_v24 = vadd.f32 %v1825_v17, %v1709_v9  ;;  %v3563_v30 = vld [vmem:[#allocation8 + $0x3f4] sm:$0xf0]  ;;  %v3523_v9 = vld [vmem:[#allocation8 + $0x2bc] sm:$0xf]  ;;  %v1711_v17 = vperm.slane %v3969_v62, 5 }
 0x13d   :  { %v3430_v33 = vld [vmem:[#allocation8 + $0x7b8] sm:$0xf]  ;;  %v2795_v20 = vor.u32 %v3523_v9, %v2792_v10 }
 0x13e   :  { %v3983_v32 = vadd.f32 %v1838_v18, %v1826_v24  ;;  %v3691_v34 = vld [vmem:[#allocation8 + $0x7f4] sm:$0xf0]  ;;  %v3507_v24 = vld [vmem:[#allocation8 + $0x23c] sm:$0xf] }
 0x13f   :  { %2054 = vmatpush.bf16.msra.mxu2 %v2655_v47  ;;  %2067 = vmatpush.bf16.msra.mxu3 %v3167_v48  ;;  %v2919_v48 = vor.u32 %v3563_v30, %v2918_v29  ;;  %v3431_v49 = vor.u32 %v3691_v34, %v3430_v33  ;;  %v2726_v18 = vld [vmem:[#allocation8 + $0x238] sm:$0xf] }
 0x140   :  { %2080 = vmatpush.bf16.msrb.mxu0 %v2659_v53  ;;  %2093 = vmatpush.bf16.msrb.mxu1 %v3171_v54  ;;  %v1812_v47 = vpop.f32.mrf.mxu3  ;;  %v2923_v53 = vor.u32 %v3555_v35, %v2920_v40  ;;  %v3435_v54 = vor.u32 %v3683_v41, %v3432_v42  ;;  %v2662_v34 = vld [vmem:[#allocation8 + $0x1b8] sm:$0xf]  ;;  %v2731_v40 = vor.u32 %v3507_v24, %v2728_v25 }
 0x141   :  { %v1799_v45 = vpop.f32.mrf.mxu2  ;;  %v3499_v35 = vld [vmem:[#allocation8 + $0x1f4] sm:$0xf0]  ;;  %v3243_v41 = vor.u32 %v3635_v26, %v3240_v27 }
 0x142   :  { %v1800_v50 = vadd.f32 %v1799_v45, %v1708_v31  ;;  %v1840_v60 = vpop.f32.mrf.mxu1  ;;  %v2727_v31 = vor.u32 %v3515_v19, %v2726_v18  ;;  %v3627_v42 = vld [vmem:[#allocation8 + $0x5f4] sm:$0xf0]  ;;  %v3619_v45 = vld [vmem:[#allocation8 + $0x5bc] sm:$0xf] }
 0x143   :  { %2055 = vmatpush.bf16.msra.mxu2 %v2591_v61  ;;  %2068 = vmatpush.bf16.msra.mxu3 %v3103_v63  ;;  %v1827_v59 = vpop.f32.mrf.mxu0  ;;  %v2856_v61 = vld [vmem:[#allocation8 + $0x378] sm:$0xf0]  ;;  %v3611_v60 = vld [vmem:[#allocation8 + $0x574] sm:$0xf0] }
 0x144   :  { %2081 = vmatpush.bf16.msrb.mxu0 %v2595_v3  ;;  %2094 = vmatpush.bf16.msrb.mxu1 %v3107_v4  ;;  %v3985_v58 = vadd.f32 %v1812_v47, %v1800_v50  ;;  %v3667_v63 = vld [vmem:[#allocation8 + $0x73c] sm:$0xf]  ;;  %v2790_v3 = vld [vmem:[#allocation8 + $0x2b8] sm:$0xf]  ;;  %v2859_v5 = vor.u32 %v3539_v57, %v2856_v61  ;;  %v2663_v50 = vor.u32 %v3499_v35, %v2662_v34 }
 0x145   :  { %v3531_v4 = vld [vmem:[#allocation8 + $0x2f4] sm:$0xf0]  ;;  %v3371_v6 = vor.u32 %v3667_v63, %v3368_v0  ;;  %v3176_v47 = vld [vmem:[#allocation8 + $0x5f8] sm:$0xf0] }
 0x146   :  { %v3179_v55 = vor.u32 %v3619_v45, %v3176_v47  ;;  %v3110_v59 = vld [vmem:[#allocation8 + $0x538] sm:$0xf]  ;;  %v3475_v61 = vld [vmem:[#allocation8 + $0x13c] sm:$0xf] }
 0x147   :  { %2056 = vmatpush.bf16.msra.mxu2 %v2527_v15  ;;  %2069 = vmatpush.bf16.msra.mxu3 %v3039_v16  ;;  %v2791_v15 = vor.u32 %v3531_v4, %v2790_v3  ;;  %v3303_v16 = vor.u32 %v3659_v8, %v3302_v7  ;;  %v2600_v0 = vld [vmem:[#allocation8 + $0x178] sm:$0xf0]  ;;  %v3111_v7 = vor.u32 %v3611_v60, %v3110_v59  ;;  %v2534_v8 = vld [vmem:[#allocation8 + $0xb8] sm:$0xf] }
 0x148   :  { %2082 = vmatpush.bf16.msrb.mxu0 %v2531_v22  ;;  %2095 = vmatpush.bf16.msrb.mxu1 %v3043_v23  ;;  %v1814_v14 = vpop.f32.mrf.mxu3  ;;  %v3238_v22 = vld [vmem:[#allocation8 + $0x638] sm:$0xf]  ;;  %v2603_v10 = vor.u32 %v3475_v61, %v2600_v0 }
 0x149   :  { %v1801_v13 = vpop.f32.mrf.mxu2  ;;  %v3643_v23 = vld [vmem:[#allocation8 + $0x674] sm:$0xf0]  ;;  %v3459_v14 = vld [vmem:[#allocation8 + $0xbc] sm:$0xf] }
 0x14a   :  { %v3239_v33 = vor.u32 %v3643_v23, %v3238_v22  ;;  %v3467_v9 = vld [vmem:[#allocation8 + $0xf4] sm:$0xf0] }
 0x14b   :  { %2057 = vmatpush.bf16.msra.mxu2 %v2463_v38  ;;  %2070 = vmatpush.bf16.msra.mxu3 %v2975_v39  ;;  %v3174_v38 = vld [vmem:[#allocation8 + $0x5b8] sm:$0xf]  ;;  %v2535_v18 = vor.u32 %v3467_v9, %v2534_v8 }
 0x14c   :  { %2083 = vmatpush.bf16.msrb.mxu0 %v2467_v43  ;;  %2096 = vmatpush.bf16.msrb.mxu1 %v2979_v44  ;;  %v3491_v43 = vld [vmem:[#allocation8 + $0x1bc] sm:$0xf]  ;;  %v3175_v51 = vor.u32 %v3627_v42, %v3174_v38  ;;  %v3046_v12 = vld [vmem:[#allocation8 + $0x4b8] sm:$0xf] }
 0x14d   :  { %v2664_v44 = vld [vmem:[#allocation8 + $0x1f8] sm:$0xf0]  ;;  %v3595_v13 = vld [vmem:[#allocation8 + $0x4f4] sm:$0xf0] }
 0x14e   :  { %2058 = vmatmul.bf16.vlgmr.msra.gmra.mxu2 %v3945_v36  ;;  %2071 = vmatmul.bf16.vlgmr.msra.gmra.mxu3 %v3947_v37  ;;  %v1877_v29 = vpop.f32.mrf.mxu0  ;;  %v1890_v30 = vpop.f32.mrf.mxu1  ;;  %v3047_v19 = vor.u32 %v3595_v13, %v3046_v12  ;;  %v2982_v26 = vld [vmem:[#allocation8 + $0x438] sm:$0xf] }
 0x14f   :  { %2102 = vmatpush.bf16.msrb.mxu2 %v2919_v48  ;;  %2115 = vmatpush.bf16.msrb.mxu3 %v3431_v49  ;;  %v1878_v39 = vadd.f32 %v1877_v29, %v1711_v17  ;;  %v1710_v48 = vperm.slane %v3969_v62, 4  ;;  %v3048_v17 = vld [vmem:[#allocation8 + $0x4f8] sm:$0xf0]  ;;  %v3579_v27 = vld [vmem:[#allocation8 + $0x474] sm:$0xf0] }
 0x150   :  { %2128 = vmatpush.bf16.msra.mxu0 %v2923_v53  ;;  %2141 = vmatpush.bf16.msra.mxu1 %v3435_v54  ;;  %v3483_v53 = vld [vmem:[#allocation8 + $0x174] sm:$0xf0]  ;;  %v2667_v54 = vor.u32 %v3491_v43, %v2664_v44  ;;  %v3443_v29 = vld [vmem:[#allocation8 + $0x3c] sm:$0xf]  ;;  %v2983_v35 = vor.u32 %v3579_v27, %v2982_v26  ;;  %v1712_v44 = vperm.slane %v3969_v62, 6 }
 0x151   :  { %2084 = vmatmul.bf16.vlgmr.msrb.gmra.mxu0 %v3945_v36  ;;  %2097 = vmatmul.bf16.vlgmr.msrb.gmra.mxu1 %v3947_v37  ;;  %v3993_v49 = vadd.f32 %v1890_v30, %v1878_v39  ;;  %v1851_v56 = vpop.f32.mrf.mxu2  ;;  %v1864_v57 = vpop.f32.mrf.mxu3  ;;  %v2472_v30 = vld [vmem:[#allocation8 + $0x78] sm:$0xf0] }
 0x152   :  { %v1852_v63 = vadd.f32 %v1851_v56, %v1710_v48  ;;  %v2475_v38 = vor.u32 %v3443_v29, %v2472_v30 }
 0x153   :  { %2103 = vmatpush.bf16.msrb.mxu2 %v2855_v1  ;;  %2116 = vmatpush.bf16.msrb.mxu3 %v3367_v2  ;;  %v3603_v1 = vld [vmem:[#allocation8 + $0x53c] sm:$0xf] }
 0x154   :  { %2129 = vmatpush.bf16.msra.mxu0 %v2859_v5  ;;  %2142 = vmatpush.bf16.msra.mxu1 %v3371_v6  ;;  %v3112_v2 = vld [vmem:[#allocation8 + $0x578] sm:$0xf0]  ;;  %v3995_v3 = vadd.f32 %v1864_v57, %v1852_v63  ;;  %v2599_v6 = vor.u32 %v3483_v53, %v2598_v52 }
 0x155   :  { %v3115_v11 = vor.u32 %v3603_v1, %v3112_v2 }
 0x156   :  { %v1879_v4 = vpop.f32.mrf.mxu0  ;;  %v1892_v5 = vpop.f32.mrf.mxu1 }
 0x157   :  { %2104 = vmatpush.bf16.msrb.mxu2 %v2791_v15  ;;  %2117 = vmatpush.bf16.msrb.mxu3 %v3303_v16  ;;  %v2536_v15 = vld [vmem:[#allocation8 + $0xf8] sm:$0xf0] }
 0x158   :  { %2130 = vmatpush.bf16.msra.mxu0 %v2795_v20  ;;  %2143 = vmatpush.bf16.msra.mxu1 %v3307_v21  ;;  %v3587_v16 = vld [vmem:[#allocation8 + $0x4bc] sm:$0xf]  ;;  %v2470_v20 = vld [vmem:[#allocation8 + $0x38] sm:$0xf]  ;;  %v2539_v22 = vor.u32 %v3459_v14, %v2536_v15 }
 0x159   :  { %v3451_v21 = vld [vmem:[#allocation8 + $0x74] sm:$0xf0]  ;;  %v3051_v23 = vor.u32 %v3587_v16, %v3048_v17  ;;  %v1853_v24 = vpop.f32.mrf.mxu2  ;;  %v1866_v25 = vpop.f32.mrf.mxu3 }
 0x15a   :  { %v2471_v34 = vor.u32 %v3451_v21, %v2470_v20 }
 0x15b   :  { %2105 = vmatpush.bf16.msrb.mxu2 %v2727_v31  ;;  %2118 = vmatpush.bf16.msrb.mxu3 %v3239_v33  ;;  %v3571_v31 = vld [vmem:[#allocation8 + $0x43c] sm:$0xf] }
 0x15c   :  { %2131 = vmatpush.bf16.msra.mxu0 %v2731_v40  ;;  %2144 = vmatpush.bf16.msra.mxu1 %v3243_v41  ;;  %v2984_v33 = vld [vmem:[#allocation8 + $0x478] sm:$0xf0]  ;;  %v1713_v40 = vperm.slane %v3969_v62, 7 }
 0x15d   :  { %v2987_v39 = vor.u32 %v3571_v31, %v2984_v33 }
 0x15f   :  { %2106 = vmatpush.bf16.msrb.mxu2 %v2663_v50  ;;  %2119 = vmatpush.bf16.msrb.mxu3 %v3175_v51 }
 0x160   :  { %2132 = vmatpush.bf16.msra.mxu0 %v2667_v54  ;;  %2145 = vmatpush.bf16.msra.mxu1 %v3179_v55  ;;  %v4007_v55 = vld [vmem:[#allocation10 + $0x8] sm:$0xff] }
 0x161   :  { %v1714_v62 = vperm.slane %v4007_v55, 0  ;;  %v1717_v24 = vperm.slane %v4007_v55, 3  ;;  %v1716_v25 = vperm.slane %v4007_v55, 2  ;;  %v1718_v26 = vperm.slane %v4007_v55, 4 }
 0x162   :  { %v1719_v29 = vperm.slane %v4007_v55, 5  ;;  %v1721_v31 = vperm.slane %v4007_v55, 7 }
 0x163   :  { %2107 = vmatpush.bf16.msrb.mxu2 %v2599_v6  ;;  %2120 = vmatpush.bf16.msrb.mxu3 %v3111_v7 }
 0x164   :  { %2133 = vmatpush.bf16.msra.mxu0 %v2603_v10  ;;  %2146 = vmatpush.bf16.msra.mxu1 %v3115_v11 }
 0x167   :  { %2108 = vmatpush.bf16.msrb.mxu2 %v2535_v18  ;;  %2121 = vmatpush.bf16.msrb.mxu3 %v3047_v19 }
 0x168   :  { %2134 = vmatpush.bf16.msra.mxu0 %v2539_v22  ;;  %2147 = vmatpush.bf16.msra.mxu1 %v3051_v23  ;;  %v2154_v23 = vlaneseq }
 0x16a   :  { %v2155_v27 = vand.u32 127, %v2154_v23 }
 0x16b   :  { %2109 = vmatpush.bf16.msrb.mxu2 %v2471_v34  ;;  %2122 = vmatpush.bf16.msrb.mxu3 %v2983_v35 }
 0x16c   :  { %2135 = vmatpush.bf16.msra.mxu0 %v2475_v38  ;;  %2148 = vmatpush.bf16.msra.mxu1 %v2987_v39  ;;  %v2170_v35 = vadd.s32 1920, %v2155_v27 }
 0x16e   :  { %2110 = vmatmul.bf16.vlgmr.msrb.gmra.mxu2 %v3945_v36  ;;  %2123 = vmatmul.bf16.vlgmr.msrb.gmra.mxu3 %v3947_v37  ;;  %v1929_v41 = vpop.f32.mrf.mxu0  ;;  %v1942_v42 = vpop.f32.mrf.mxu1  ;;  %vm2186_vm2 = vcmp.lt.s32.totalorder %v2170_v35, 2000 }
 0x16f   :  { %2136 = vmatmul.bf16.vlgmr.msra.gmra.mxu0 %v3945_v36  ;;  %2149 = vmatmul.bf16.vlgmr.msra.gmra.mxu1 %v3947_v37  ;;  %v1930_v43 = vadd.f32 %v1929_v41, %v1713_v40  ;;  %v1715_v37 = vperm.slane %v4007_v55, 1  ;;  %v2205_v41 = vsel %vm2203_vm1, %v3977_v28, -inf }
 0x171   :  { %v4003_v45 = vadd.f32 %v1942_v42, %v1930_v43  ;;  %v1903_v47 = vpop.f32.mrf.mxu2  ;;  %v1916_v48 = vpop.f32.mrf.mxu3  ;;  %v2208_v42 = vsel %vm2203_vm1, %v3995_v3, -inf }
 0x172   :  { %v1904_v50 = vadd.f32 %v1903_v47, %v1712_v44 }
 0x174   :  { %v4005_v51 = vadd.f32 %v1916_v48, %v1904_v50  ;;  %v1720_v50 = vperm.slane %v4007_v55, 6 }
 0x176   :  { %v1931_v52 = vpop.f32.mrf.mxu0  ;;  %v1944_v53 = vpop.f32.mrf.mxu1 }
 0x177   :  { %v2204_v52 = vsel %vm2203_vm1, %v3979_v46, -inf  ;;  %v2207_v53 = vsel %vm2203_vm1, %v3983_v32, -inf }
 0x179   :  { %v1905_v54 = vpop.f32.mrf.mxu2  ;;  %v1918_v36 = vpop.f32.mrf.mxu3 }
 0x17a   :  { %v2210_v54 = vsel %vm2203_vm1, %v3993_v49, -inf }
 0x18e   :  { %v1981_v56 = vpop.f32.mrf.mxu0  ;;  %v1994_v57 = vpop.f32.mrf.mxu1 }
 0x18f   :  { %v1982_v59 = vadd.f32 %v1981_v56, %v1715_v37  ;;  %v2214_v37 = vsel %vm2203_vm1, %v4003_v45, -inf  ;;  %v2212_v56 = vsel %vm2203_vm1, %v4005_v51, -inf }
 0x191   :  { %v4011_v60 = vadd.f32 %v1994_v57, %v1982_v59  ;;  %v1955_v61 = vpop.f32.mrf.mxu2  ;;  %v1968_v63 = vpop.f32.mrf.mxu3  ;;  %v2206_v59 = vsel %vm2203_vm1, %v3985_v58, -inf }
 0x192   :  { %v1956_v0 = vadd.f32 %v1955_v61, %v1714_v62  ;;  %v2209_v62 = vmax.f32 %v2204_v52, %v2208_v42 }
 0x193   :  { %v2218_v61 = vsel %vm2203_vm1, %v4011_v60, -inf }
 0x194   :  { %v4013_v1 = vadd.f32 %v1968_v63, %v1956_v0 }
 0x196   :  { %v1983_v2 = vpop.f32.mrf.mxu0  ;;  %v1996_v4 = vpop.f32.mrf.mxu1  ;;  %v2216_v57 = vsel %vm2203_vm1, %v4013_v1, -inf }
 0x199   :  { %v1957_v5 = vpop.f32.mrf.mxu2  ;;  %v1970_v6 = vpop.f32.mrf.mxu3 }
 0x1ae   :  { %v2033_v7 = vpop.f32.mrf.mxu0  ;;  %v2046_v8 = vpop.f32.mrf.mxu1 }
 0x1af   :  { %v2034_v30 = vadd.f32 %v2033_v7, %v1717_v24 }
 0x1b1   :  { %v2007_v9 = vpop.f32.mrf.mxu2  ;;  %v2020_v10 = vpop.f32.mrf.mxu3  ;;  %v4024_v43 = vadd.f32 %v2046_v8, %v2034_v30  ;;  %v2211_v8 = vmax.f32 %v2205_v41, %v2210_v54 }
 0x1b2   :  { %v2008_v33 = vadd.f32 %v2007_v9, %v1716_v25  ;;  %v2215_v9 = vmax.f32 %v2207_v53, %v2214_v37 }
 0x1b3   :  { %v2222_v4 = vsel %vm2203_vm1, %v4024_v43, -inf }
 0x1b4   :  { %v4026_v47 = vadd.f32 %v2020_v10, %v2008_v33  ;;  %v2213_v10 = vmax.f32 %v2206_v59, %v2212_v56 }
 0x1b6   :  { %v2035_v11 = vpop.f32.mrf.mxu0  ;;  %v2048_v12 = vpop.f32.mrf.mxu1  ;;  %v2220_v5 = vsel %vm2203_vm1, %v4026_v47, -inf }
 0x1b7   :  { %v2217_v11 = vmax.f32 %v2209_v62, %v2216_v57 }
 0x1b9   :  { %v2009_v13 = vpop.f32.mrf.mxu2  ;;  %v2022_v14 = vpop.f32.mrf.mxu3 }
 0x1ce   :  { %v2085_v15 = vpop.f32.mrf.mxu0  ;;  %v2098_v16 = vpop.f32.mrf.mxu1 }
 0x1cf   :  { %v2086_v38 = vadd.f32 %v2085_v15, %v1719_v29 }
 0x1d1   :  { %v2059_v17 = vpop.f32.mrf.mxu2  ;;  %v2072_v18 = vpop.f32.mrf.mxu3  ;;  %v4043_v55 = vadd.f32 %v2098_v16, %v2086_v38 }
 0x1d2   :  { %v2060_v34 = vadd.f32 %v2059_v17, %v1718_v26  ;;  %v2219_v17 = vmax.f32 %v2211_v8, %v2218_v61 }
 0x1d3   :  { %v2226_v16 = vsel %vm2203_vm1, %v4043_v55, -inf }
 0x1d4   :  { %v4028_v48 = vadd.f32 %v2072_v18, %v2060_v34  ;;  %v2221_v18 = vmax.f32 %v2213_v10, %v2220_v5 }
 0x1d6   :  { %v2087_v19 = vpop.f32.mrf.mxu0  ;;  %v2100_v20 = vpop.f32.mrf.mxu1  ;;  %v2224_v7 = vsel %vm2203_vm1, %v4028_v48, -inf }
 0x1d7   :  { %v2223_v19 = vmax.f32 %v2215_v9, %v2222_v4  ;;  %v2225_v20 = vmax.f32 %v2217_v11, %v2224_v7 }
 0x1d9   :  { %v2061_v21 = vpop.f32.mrf.mxu2  ;;  %v2074_v22 = vpop.f32.mrf.mxu3 }
 0x1da   :  { %v2227_v22 = vmax.f32 %v2219_v17, %v2226_v16 }
 0x1dc   :  { %v2232_v27 = vmax.f32 %v2225_v20, %v2227_v22 }
 0x1ec   :  { %v2137_v39 = vpop.f32.mrf.mxu0  ;;  %v2150_v40 = vpop.f32.mrf.mxu1 }
 0x1ed   :  { %v2138_v44 = vadd.f32 %v2137_v39, %v1721_v31 }
 0x1ef   :  { %v2151_v36 = vadd.f32 %v2150_v40, %v2138_v44 }
 0x1f1   :  { %v4049_v63 = vsel %vm2186_vm2, %v2151_v36, -inf  ;;  %v2111_v0 = vpop.f32.mrf.mxu2  ;;  %v2124_v2 = vpop.f32.mrf.mxu3 }
 0x1f2   :  { %v2112_v6 = vadd.f32 %v2111_v0, %v1720_v50  ;;  %v2230_v12 = vsel %vm2203_vm1, %v4049_v63, -inf }
 0x1f3   :  { %v2231_v24 = vmax.f32 %v2223_v19, %v2230_v12 }
 0x1f4   :  { %v4059_v13 = vadd.f32 %v2124_v2, %v2112_v6  ;;  %v2139_v14 = vpop.f32.mrf.mxu0  ;;  %v2152_v15 = vpop.f32.mrf.mxu1 }
 0x1f6   :  { %v2228_v21 = vsel %vm2203_vm1, %v4059_v13, -inf }
 0x1f7   :  { %v2229_v23 = vmax.f32 %v2221_v18, %v2228_v21 }
 0x1f9   :  { %v2113_v25 = vpop.f32.mrf.mxu2  ;;  %v2126_v26 = vpop.f32.mrf.mxu3  ;;  %v2233_v29 = vmax.f32 %v2229_v23, %v2231_v24 }
 0x1fb   :  { %v2234_v30 = vmax.f32 %v2232_v27, %v2233_v29 }
 0x1fd   :  { %2235 = vmax.xlane.f32.xlu0 %v2234_v30 }
 0x270   :  { %v4065_v31 = vpop.xlane.xlu0 %2235 }
 0x271   :  { %v2237_v33 = vsub.f32 %v3979_v46, %v4065_v31  ;;  %v2238_v34 = vsub.f32 %v3977_v28, %v4065_v31  ;;  %v2239_v35 = vsub.f32 %v3985_v58, %v4065_v31  ;;  %v2240_v38 = vsub.f32 %v3983_v32, %v4065_v31 }
 0x272   :  { %v2241_v39 = vsub.f32 %v3995_v3, %v4065_v31  ;;  %v2242_v44 = vsub.f32 %v3993_v49, %v4065_v31  ;;  %v2243_v52 = vsub.f32 %v4005_v51, %v4065_v31  ;;  %v2244_v54 = vsub.f32 %v4003_v45, %v4065_v31 }
 0x273   :  { %v2253_v40 = vmul.f32 1.442695, %v2237_v33  ;;  %v2255_v41 = vmul.f32 1.442695, %v2238_v34  ;;  %v2257_v42 = vmul.f32 1.442695, %v2239_v35  ;;  %v2245_v37 = vsub.f32 %v4013_v1, %v4065_v31 }
 0x274   :  { %v2259_v50 = vmul.f32 1.442695, %v2240_v38  ;;  %v2261_v53 = vmul.f32 1.442695, %v2241_v39  ;;  %v2263_v36 = vmul.f32 1.442695, %v2242_v44  ;;  %v2246_v62 = vsub.f32 %v4011_v60, %v4065_v31 }
 0x275   :  { %3702 = vpow2.f32 %v2253_v40  ;;  %v2265_v56 = vmul.f32 1.442695, %v2243_v52  ;;  %v2267_v61 = vmul.f32 1.442695, %v2244_v54  ;;  %v2247_v6 = vsub.f32 %v4026_v47, %v4065_v31 }
 0x276   :  { %3704 = vpow2.f32 %v2255_v41  ;;  %v2269_v7 = vmul.f32 1.442695, %v2245_v37  ;;  %v2248_v11 = vsub.f32 %v4024_v43, %v4065_v31  ;;  %v2271_v12 = vmul.f32 1.442695, %v2246_v62 }
 0x277   :  { %3706 = vpow2.f32 %v2257_v42  ;;  %v2249_v17 = vsub.f32 %v4028_v48, %v4065_v31  ;;  %v2273_v18 = vmul.f32 1.442695, %v2247_v6  ;;  %v2250_v22 = vsub.f32 %v4043_v55, %v4065_v31 }
 0x278   :  { %3708 = vpow2.f32 %v2259_v50  ;;  %v2275_v23 = vmul.f32 1.442695, %v2248_v11  ;;  %v2251_v27 = vsub.f32 %v4059_v13, %v4065_v31  ;;  %v2252_v35 = vsub.f32 %v4049_v63, %v4065_v31 }
 0x279   :  { %3710 = vpow2.f32 %v2261_v53  ;;  %v2277_v29 = vmul.f32 1.442695, %v2249_v17  ;;  %v2279_v38 = vmul.f32 1.442695, %v2250_v22 }
 0x27a   :  { %3712 = vpow2.f32 %v2263_v36  ;;  %v2281_v42 = vmul.f32 1.442695, %v2251_v27  ;;  %v2283_v53 = vmul.f32 1.442695, %v2252_v35 }
 0x27b   :  { %v3703_v57 = vpop.eup %3702  ;;  %3714 = vpow2.f32 %v2265_v56 }
 0x27c   :  { %v3705_v59 = vpop.eup %3704  ;;  %v2285_v0 = vsel %vm2203_vm1, %v3703_v57, 0.0  ;;  %3716 = vpow2.f32 %v2267_v61 }
 0x27d   :  { %v3707_v2 = vpop.eup %3706  ;;  %v2286_v4 = vsel %vm2203_vm1, %v3705_v59, 0.0  ;;  %3718 = vpow2.f32 %v2269_v7 }
 0x27e   :  { %v3709_v5 = vpop.eup %3708  ;;  %v2287_v8 = vadd.f32 %v2286_v4, %v2285_v0  ;;  %v2288_v9 = vsel %vm2203_vm1, %v3707_v2, 0.0  ;;  %3720 = vpow2.f32 %v2271_v12 }
 0x27f   :  { %v3711_v10 = vpop.eup %3710  ;;  %v2290_v15 = vsel %vm2203_vm1, %v3709_v5, 0.0  ;;  %3722 = vpow2.f32 %v2273_v18 }
 0x280   :  { %v2289_v14 = vadd.f32 %v2288_v9, %v2287_v8  ;;  %v3713_v16 = vpop.eup %3712  ;;  %v2292_v20 = vsel %vm2203_vm1, %v3711_v10, 0.0  ;;  %3724 = vpow2.f32 %v2275_v23 }
 0x281   :  { %v3715_v21 = vpop.eup %3714  ;;  %v2294_v25 = vsel %vm2203_vm1, %v3713_v16, 0.0  ;;  %3726 = vpow2.f32 %v2277_v29 }
 0x282   :  { %v2291_v19 = vadd.f32 %v2290_v15, %v2289_v14  ;;  %v3717_v26 = vpop.eup %3716  ;;  %v2296_v33 = vsel %vm2203_vm1, %v3715_v21, 0.0  ;;  %3728 = vpow2.f32 %v2279_v38 }
 0x283   :  { %v3719_v34 = vpop.eup %3718  ;;  %v2298_v40 = vsel %vm2203_vm1, %v3717_v26, 0.0  ;;  %3730 = vpow2.f32 %v2281_v42 }
 0x284   :  { %v2293_v24 = vadd.f32 %v2292_v20, %v2291_v19  ;;  %v3721_v41 = vpop.eup %3720  ;;  %v2300_v50 = vsel %vm2203_vm1, %v3719_v34, 0.0  ;;  %3732 = vpow2.f32 %v2283_v53 }
 0x285   :  { %v3723_v52 = vpop.eup %3722  ;;  %v2302_v36 = vsel %vm2203_vm1, %v3721_v41, 0.0 }
 0x286   :  { %v2295_v30 = vadd.f32 %v2294_v25, %v2293_v24  ;;  %v3725_v37 = vpop.eup %3724  ;;  %v2304_v57 = vsel %vm2203_vm1, %v3723_v52, 0.0 }
 0x287   :  { %v3727_v59 = vpop.eup %3726  ;;  %v2306_v61 = vsel %vm2203_vm1, %v3725_v37, 0.0 }
 0x288   :  { %v2297_v39 = vadd.f32 %v2296_v33, %v2295_v30  ;;  %v3729_v0 = vpop.eup %3728  ;;  %v2308_v4 = vsel %vm2203_vm1, %v3727_v59, 0.0 }
 0x289   :  { %v3731_v5 = vpop.eup %3730  ;;  %v2310_v7 = vsel %vm2203_vm1, %v3729_v0, 0.0 }
 0x28a   :  { %v2299_v44 = vadd.f32 %v2298_v40, %v2297_v39  ;;  %v3733_v8 = vpop.eup %3732  ;;  %v2312_v10 = vsel %vm2203_vm1, %v3731_v5, 0.0 }
 0x28b   :  { %v2314_v12 = vsel %vm2203_vm1, %v3733_v8, 0.0 }
 0x28c   :  { %v2301_v54 = vadd.f32 %v2300_v50, %v2299_v44 }
 0x28e   :  { %v2303_v56 = vadd.f32 %v2302_v36, %v2301_v54 }
 0x290   :  { %v2305_v62 = vadd.f32 %v2304_v57, %v2303_v56 }
 0x292   :  { %v2307_v2 = vadd.f32 %v2306_v61, %v2305_v62 }
 0x294   :  { %v2309_v6 = vadd.f32 %v2308_v4, %v2307_v2 }
 0x296   :  { %v2311_v9 = vadd.f32 %v2310_v7, %v2309_v6 }
 0x298   :  { %v2313_v11 = vadd.f32 %v2312_v10, %v2311_v9 }
 0x29a   :  { %v2315_v14 = vadd.f32 %v2314_v12, %v2313_v11 }
 0x29c   :  { %2316 = vadd.xlane.f32.xlu0 %v2315_v14 }
 0x30f   :  { %v2317_v15 = vpop.xlane.xlu0 %2316 }
 0x310   :  { %3734 = vlog2.f32 %v2317_v15 }
 0x316   :  { %v3735_v16 = vpop.eup %3734 }
 0x317   :  { %v2319_v17 = vmul.f32 0.6931472, %v3735_v16 }
 0x319   :  { %v2320_v18 = vadd.f32 %v2319_v17, %v4065_v31 }
 0x31b   :  { %v2321_v19 = vsub.f32 %v3979_v46, %v2320_v18  ;;  %v2322_v20 = vsub.f32 %v3977_v28, %v2320_v18  ;;  %v2323_v21 = vsub.f32 %v3985_v58, %v2320_v18  ;;  %v2324_v22 = vsub.f32 %v3983_v32, %v2320_v18 }
 0x31c   :  { %v2325_v23 = vsub.f32 %v3995_v3, %v2320_v18  ;;  %v2326_v24 = vsub.f32 %v3993_v49, %v2320_v18  ;;  %v2327_v31 = vsub.f32 %v4005_v51, %v2320_v18  ;;  %v2328_v25 = vsub.f32 %v4003_v45, %v2320_v18 }
 0x31d   :  { %v2329_v26 = vsub.f32 %v4013_v1, %v2320_v18  ;;  %v2330_v27 = vsub.f32 %v4011_v60, %v2320_v18  ;;  %v2331_v46 = vsub.f32 %v4026_v47, %v2320_v18  ;;  %v2332_v28 = vsub.f32 %v4024_v43, %v2320_v18 }
 0x31e   :  { %v2333_v58 = vsub.f32 %v4028_v48, %v2320_v18  ;;  %v2334_v32 = vsub.f32 %v4043_v55, %v2320_v18  ;;  %v2335_v3 = vsub.f32 %v4059_v13, %v2320_v18  ;;  %v2336_v49 = vsub.f32 %v4049_v63, %v2320_v18 }
 0x31f   :  { %v2353_v29 = vrot.slane %v2322_v20, 7  ;;  %v2354_v51 = vrot.slane %v2323_v21, 6  ;;  %v2355_v30 = vrot.slane %v2324_v22, 5  ;;  %v2356_v45 = vrot.slane %v2325_v23, 4 }
 0x320   :  { %v2357_v33 = vrot.slane %v2326_v24, 3  ;;  %v2358_v1 = vrot.slane %v2327_v31, 2  ;;  %v2359_v34 = vrot.slane %v2328_v25, 1  ;;  %v2360_v60 = vrot.slane %v2330_v27, 7 }
 0x321   :  { %v2361_v35 = vrot.slane %v2331_v46, 6  ;;  %v2362_v47 = vrot.slane %v2332_v28, 5  ;;  %v2363_v38 = vrot.slane %v2333_v58, 4  ;;  %v2364_v43 = vrot.slane %v2334_v32, 3 }
 0x322   :  { %v2365_v39 = vrot.slane %v2335_v3, 2  ;;  %v2366_v48 = vrot.slane %v2336_v49, 1  ;;  %v2367_v55 = vsel %vm2203_vm1, %v2321_v19, %v2353_v29  ;;  %v2369_v13 = vsel %vm2368_vm3, %v2354_v51, %v2355_v30 }
 0x323   :  { %v2371_v63 = vsel %vm2370_vm4, %v2367_v55, %v2369_v13  ;;  %v2373_v40 = vsel %vm2372_vm5, %v2356_v45, %v2357_v33  ;;  %v2375_v41 = vsel %vm2374_vm6, %v2358_v1, %v2359_v34  ;;  %v2380_v42 = vsel %vm2203_vm1, %v2329_v26, %v2360_v60 }
 0x324   :  { %v2377_v44 = vsel %vm2376_vm7, %v2373_v40, %v2375_v41  ;;  %v2381_v50 = vsel %vm2368_vm3, %v2361_v35, %v2362_v47  ;;  %v2383_v52 = vsel %vm2372_vm5, %v2363_v38, %v2364_v43  ;;  %v2384_v53 = vsel %vm2374_vm6, %v2365_v39, %v2366_v48 }
 0x325   :  { %v2379_v54 = vsel %vm2378_vm8, %v2371_v63, %v2377_v44  ;;  %v2382_v36 = vsel %vm2370_vm4, %v2380_v42, %v2381_v50  ;;  %v2385_v37 = vsel %vm2376_vm7, %v2383_v52, %v2384_v53 }
 0x326   :  { %v2386_v56 = vsel %vm2378_vm8, %v2382_v36, %v2385_v37  ;;  %2389 = vst [vmem:[#allocation11] sm:$0xff] %v2379_v54 }
 0x327   :  { %2390 = vst [vmem:[#allocation11 + $0x8] sm:$0xff] %v2386_v56 }
 0x328   :  { %2401 = dma.vmem_to_hbm [thread:$0]  %s2397_s4, 256, %s2399_s21, [#allocation4]  }
 0x329   :  { %3886 = dma.done.wait [#allocation4], 256  }
 0x32a   :  { %3887 = vsyncadd [#allocation4], 4294967040 }
 0x32b   :  { %2406 = vsyncpa [#allocation3], 1 }
 0x32c   :  { %2407 = vsyncpa [#allocation6], 1 }
 0x32d   :  { %2408 = vsyncpa [#allocation9], 1 }
 0x32e   :  { %2409 = vsyncpa [#allocation4], 1 }

</bundles_post_ra>
